<compile_context>
chip_gen: v7x
topology: tpu7x:2x2x1
jax: 0.10.0
libtpu: 0.0.40
codegen_flags: <defaults>
</compile_context>

<pallas_src>
import jax
import jax.numpy as jnp
from jax import lax
from jax.experimental import pallas as pl
from jax.experimental.pallas import tpu as pltpu

IN_DIM = 2
HIDDEN = 2 ** 12          # 4096
OUT_DIM = 1

LANES = 128
HIDDEN_CHUNK = 512                       # lanes per hidden chunk (multiple of 128)
NUM_CHUNKS = HIDDEN // HIDDEN_CHUNK      # 8
ROW_TILE = 256                           # TN cap; <=1024 keeps v7x (64 MiB VMEM) safe


def mlp_kernel(x_ref, w1_ref, b1_ref, w2_ref, b2_ref, o_ref):
    """Fused fc1 -> ReLU -> fc2 for one TN-row tile.

    x_ref:  (TN, 2)       activations tile (VMEM)
    w1_ref: (2, HIDDEN)   fc1 weight, pre-transposed, resident (VMEM)
    b1_ref: (1, HIDDEN)   fc1 bias, resident (VMEM)
    w2_ref: (1, HIDDEN)   fc2 weight, lane-dense, resident (VMEM)
    b2_ref: (1, 1)        fc2 bias (SMEM scalar)
    o_ref:  (TN, 1)       output tile (VMEM)
    """
    tn = x_ref.shape[0]
    x = x_ref[...]                                           # (TN, 2)
    # Hoist the per-column lane-broadcasts out of the chunk loop.
    x0 = jnp.broadcast_to(x[:, 0:1], (tn, HIDDEN_CHUNK))     # (TN, HC)
    x1 = jnp.broadcast_to(x[:, 1:2], (tn, HIDDEN_CHUNK))     # (TN, HC)

    def chunk_body(c, acc):
        lo = pl.multiple_of(c * HIDDEN_CHUNK, HIDDEN_CHUNK)
        w1c = w1_ref[:, pl.ds(lo, HIDDEN_CHUNK)]             # (2, HC)
        b1c = b1_ref[:, pl.ds(lo, HIDDEN_CHUNK)]             # (1, HC)
        w2c = w2_ref[:, pl.ds(lo, HIDDEN_CHUNK)]             # (1, HC)

        # fc1 (K=2) as two VPU broadcast FMAs + bias, then ReLU.
        # TODO(synk): for large TN, benchmark jnp.dot(x, w1c) on the otherwise-idle
        #             MXU (and bf16 h/w2 on v6e/v7x) against this VALU-bound path.
        h = x0 * w1c[0:1, :] + x1 * w1c[1:2, :] + b1c         # (TN, HC)
        h = jnp.maximum(h, 0.0)

        # fc2 partial: lane-dense multiply, then fold HC lanes into a 128-lane
        # partial with lane-aligned VALU adds (no per-chunk XLU reduce).
        p = h * w2c                                           # (TN, HC)
        part = p[:, 0:LANES]
        for j in range(1, HIDDEN_CHUNK // LANES):
            part = part + p[:, j * LANES:(j + 1) * LANES]
        return acc + part                                     # (TN, 128)

    acc = jnp.zeros((tn, LANES), jnp.float32)
    acc = lax.fori_loop(0, NUM_CHUNKS, chunk_body, acc, unroll=True)

    # Single cross-lane (XLU) reduce + scalar bias, store the (TN, 1) tile.
    out = jnp.sum(acc, axis=-1, keepdims=True) + b2_ref[0, 0]
    o_ref[...] = out.astype(o_ref.dtype)


def _round_up(x, m):
    return (x + m - 1) // m * m


@jax.jit
def mlp_forward(din, w1, b1, w2, b2):
    # Reproduce `din.view(-1, 2)`.
    x = din.reshape(-1, IN_DIM).astype(jnp.float32)
    n = x.shape[0]

    w1 = w1.astype(jnp.float32)
    b1_2d = b1.reshape(1, HIDDEN).astype(jnp.float32)
    w2_row = w2.reshape(1, HIDDEN).astype(jnp.float32)   # (HIDDEN, 1) -> lane-dense (1, HIDDEN)
    b2_2d = b2.reshape(1, OUT_DIM).astype(jnp.float32)

    # Row-tile choice: up to ROW_TILE rows per grid step (multiple of 8); pad N
    # to a multiple of the tile and slice the padding off afterwards.
    tn = ROW_TILE if n >= ROW_TILE else max(8, _round_up(n, 8))
    n_pad = _round_up(n, tn)
    if n_pad != n:
        x = jnp.pad(x, ((0, n_pad - n), (0, 0)))

    out = pl.pallas_call(
        mlp_kernel,
        out_shape=jax.ShapeDtypeStruct((n_pad, OUT_DIM), jnp.float32),
        grid_spec=pltpu.PrefetchScalarGridSpec(
            num_scalar_prefetch=0,
            grid=(n_pad // tn,),
            in_specs=[
                pl.BlockSpec((tn, IN_DIM), lambda i: (i, 0)),        # x: tiled over rows
                pl.BlockSpec((IN_DIM, HIDDEN), lambda i: (0, 0)),    # w1: VMEM resident
                pl.BlockSpec((1, HIDDEN), lambda i: (0, 0)),         # b1: VMEM resident
                pl.BlockSpec((1, HIDDEN), lambda i: (0, 0)),         # w2: VMEM resident
                pl.BlockSpec(memory_space=pltpu.MemorySpace.SMEM),   # b2: SMEM scalar
            ],
            out_specs=pl.BlockSpec((tn, OUT_DIM), lambda i: (i, 0)),
        ),
        compiler_params=pltpu.CompilerParams(
            dimension_semantics=("parallel",),          # megacore split on v7x
            vmem_limit_bytes=32 * 1024 * 1024,          # plenty; safe on v5e/v6e/v7x
        ),
    )(x, w1, b1_2d, w2_row, b2_2d)
    return out[:n]


def init_params(key):
    """Deterministic init mirroring torch.nn.Linear default (U(-1/sqrt(fan_in), +))."""
    k1, k2, k3, k4 = jax.random.split(key, 4)
    bound1 = 1.0 / jnp.sqrt(jnp.float32(IN_DIM))
    bound2 = 1.0 / jnp.sqrt(jnp.float32(HIDDEN))
    # Stored pre-transposed: (in, out).
    w1 = jax.random.uniform(k1, (IN_DIM, HIDDEN), jnp.float32, -bound1, bound1)
    b1 = jax.random.uniform(k2, (HIDDEN,), jnp.float32, -bound1, bound1)
    w2 = jax.random.uniform(k3, (HIDDEN, OUT_DIM), jnp.float32, -bound2, bound2)
    b2 = jax.random.uniform(k4, (OUT_DIM,), jnp.float32, -bound2, bound2)
    return w1, b1, w2, b2


def mlp_reference(din, w1, b1, w2, b2):
    x = din.reshape(-1, IN_DIM).astype(jnp.float32)
    hp = jax.lax.Precision.HIGHEST  # full-f32 reference
    h = jnp.maximum(jnp.dot(x, w1, precision=hp) + b1, 0.0)
    return jnp.dot(h, w2, precision=hp) + b2


if __name__ == "__main__":
    key = jax.random.PRNGKey(0)
    k_params, k_in = jax.random.split(key)
    w1, b1, w2, b2 = init_params(k_params)

    # Small input; forward views it as (-1, 2) -> (16, 2).
    din = jax.random.normal(k_in, (8, 2, 2), jnp.float32)

    out = mlp_forward(din, w1, b1, w2, b2)
    out = jax.block_until_ready(out)

    ref = mlp_reference(din, w1, b1, w2, b2)
    assert out.shape == (16, 1), out.shape
    assert jnp.allclose(out, ref, atol=1e-3, rtol=1e-4), "mismatch vs reference"

    print("KERNEL_OK")
</pallas_src>

<mosaic_0001>
module attributes {stable_mosaic.version = 11 : i64} {
  func.func @mlp_kernel(%arg0: i32, %arg1: memref<16x2xf32, #tpu.memory_space<vmem>>, %arg2: memref<2x4096xf32, #tpu.memory_space<vmem>>, %arg3: memref<1x4096xf32, #tpu.memory_space<vmem>>, %arg4: memref<1x4096xf32, #tpu.memory_space<vmem>>, %arg5: memref<1x1xf32, #tpu.memory_space<smem>>, %arg6: memref<16x1xf32, #tpu.memory_space<vmem>>) attributes {dimension_semantics = [#tpu.dimension_semantics<parallel>], iteration_bounds = array<i64: 1>, scalar_prefetch = 0 : i64, scratch_operands = 0 : i64, tpu.core_type = #tpu.core_type<tc>, window_params = [{transform_indices = @transform_0, window_bounds = array<i64: 16, 2>}, {pipeline_mode = #tpu.pipeline_mode<synchronous>, transform_indices = @transform_1, window_bounds = array<i64: 2, 4096>}, {pipeline_mode = #tpu.pipeline_mode<synchronous>, transform_indices = @transform_2, window_bounds = array<i64: 1, 4096>}, {pipeline_mode = #tpu.pipeline_mode<synchronous>, transform_indices = @transform_3, window_bounds = array<i64: 1, 4096>}, {transform_indices = @transform_4, window_bounds = array<i64: 1, 1>}, {transform_indices = @transform_5, window_bounds = array<i64: 16, 1>}]} {
    %c0 = arith.constant 0 : index
    %c0_0 = arith.constant 0 : index
    %0 = vector.load %arg1[%c0, %c0_0] : memref<16x2xf32, #tpu.memory_space<vmem>>, vector<16x2xf32>
    %1 = vector.extract_strided_slice %0 {offsets = [0, 0], sizes = [16, 1], strides = [1, 1]} : vector<16x2xf32> to vector<16x1xf32>
    %2 = vector.shape_cast %1 : vector<16x1xf32> to vector<16x1xf32>
    %3 = vector.broadcast %2 : vector<16x1xf32> to vector<16x512xf32>
    %4 = vector.extract_strided_slice %0 {offsets = [0, 1], sizes = [16, 1], strides = [1, 1]} : vector<16x2xf32> to vector<16x1xf32>
    %5 = vector.shape_cast %4 : vector<16x1xf32> to vector<16x1xf32>
    %6 = vector.broadcast %5 : vector<16x1xf32> to vector<16x512xf32>
    %cst = arith.constant 0.000000e+00 : f32
    %7 = vector.broadcast %cst : f32 to vector<16x128xf32>
    %c0_i32 = arith.constant 0 : i32
    %c512_i32 = arith.constant 512 : i32
    %8 = arith.muli %c0_i32, %c512_i32 : i32
    %9 = tpu.assume_multiple %8, 512 : i32
    %c0_1 = arith.constant 0 : index
    %10 = arith.index_cast %9 : i32 to index
    %11 = vector.load %arg2[%c0_1, %10] : memref<2x4096xf32, #tpu.memory_space<vmem>>, vector<2x512xf32>
    %c0_2 = arith.constant 0 : index
    %12 = arith.index_cast %9 : i32 to index
    %13 = vector.load %arg3[%c0_2, %12] : memref<1x4096xf32, #tpu.memory_space<vmem>>, vector<1x512xf32>
    %c0_3 = arith.constant 0 : index
    %14 = arith.index_cast %9 : i32 to index
    %15 = vector.load %arg4[%c0_3, %14] : memref<1x4096xf32, #tpu.memory_space<vmem>>, vector<1x512xf32>
    %16 = vector.extract_strided_slice %11 {offsets = [0, 0], sizes = [1, 512], strides = [1, 1]} : vector<2x512xf32> to vector<1x512xf32>
    %17 = vector.broadcast %16 : vector<1x512xf32> to vector<16x512xf32>
    %18 = arith.mulf %3, %17 : vector<16x512xf32>
    %19 = vector.extract_strided_slice %11 {offsets = [1, 0], sizes = [1, 512], strides = [1, 1]} : vector<2x512xf32> to vector<1x512xf32>
    %20 = vector.broadcast %19 : vector<1x512xf32> to vector<16x512xf32>
    %21 = arith.mulf %6, %20 : vector<16x512xf32>
    %22 = arith.addf %18, %21 : vector<16x512xf32>
    %23 = vector.broadcast %13 : vector<1x512xf32> to vector<16x512xf32>
    %24 = arith.addf %22, %23 : vector<16x512xf32>
    %cst_4 = arith.constant 0.000000e+00 : f32
    %25 = vector.broadcast %cst_4 : f32 to vector<16x512xf32>
    %26 = arith.maximumf %24, %25 : vector<16x512xf32>
    %27 = vector.broadcast %15 : vector<1x512xf32> to vector<16x512xf32>
    %28 = arith.mulf %26, %27 : vector<16x512xf32>
    %29 = vector.extract_strided_slice %28 {offsets = [0, 0], sizes = [16, 128], strides = [1, 1]} : vector<16x512xf32> to vector<16x128xf32>
    %30 = vector.extract_strided_slice %28 {offsets = [0, 128], sizes = [16, 128], strides = [1, 1]} : vector<16x512xf32> to vector<16x128xf32>
    %31 = arith.addf %29, %30 : vector<16x128xf32>
    %32 = vector.extract_strided_slice %28 {offsets = [0, 256], sizes = [16, 128], strides = [1, 1]} : vector<16x512xf32> to vector<16x128xf32>
    %33 = arith.addf %31, %32 : vector<16x128xf32>
    %34 = vector.extract_strided_slice %28 {offsets = [0, 384], sizes = [16, 128], strides = [1, 1]} : vector<16x512xf32> to vector<16x128xf32>
    %35 = arith.addf %33, %34 : vector<16x128xf32>
    %36 = arith.addf %7, %35 : vector<16x128xf32>
    %c1_i32 = arith.constant 1 : i32
    %c512_i32_5 = arith.constant 512 : i32
    %37 = arith.muli %c1_i32, %c512_i32_5 : i32
    %38 = tpu.assume_multiple %37, 512 : i32
    %c0_6 = arith.constant 0 : index
    %39 = arith.index_cast %38 : i32 to index
    %40 = vector.load %arg2[%c0_6, %39] : memref<2x4096xf32, #tpu.memory_space<vmem>>, vector<2x512xf32>
    %c0_7 = arith.constant 0 : index
    %41 = arith.index_cast %38 : i32 to index
    %42 = vector.load %arg3[%c0_7, %41] : memref<1x4096xf32, #tpu.memory_space<vmem>>, vector<1x512xf32>
    %c0_8 = arith.constant 0 : index
    %43 = arith.index_cast %38 : i32 to index
    %44 = vector.load %arg4[%c0_8, %43] : memref<1x4096xf32, #tpu.memory_space<vmem>>, vector<1x512xf32>
    %45 = vector.extract_strided_slice %40 {offsets = [0, 0], sizes = [1, 512], strides = [1, 1]} : vector<2x512xf32> to vector<1x512xf32>
    %46 = vector.broadcast %45 : vector<1x512xf32> to vector<16x512xf32>
    %47 = arith.mulf %3, %46 : vector<16x512xf32>
    %48 = vector.extract_strided_slice %40 {offsets = [1, 0], sizes = [1, 512], strides = [1, 1]} : vector<2x512xf32> to vector<1x512xf32>
    %49 = vector.broadcast %48 : vector<1x512xf32> to vector<16x512xf32>
    %50 = arith.mulf %6, %49 : vector<16x512xf32>
    %51 = arith.addf %47, %50 : vector<16x512xf32>
    %52 = vector.broadcast %42 : vector<1x512xf32> to vector<16x512xf32>
    %53 = arith.addf %51, %52 : vector<16x512xf32>
    %cst_9 = arith.constant 0.000000e+00 : f32
    %54 = vector.broadcast %cst_9 : f32 to vector<16x512xf32>
    %55 = arith.maximumf %53, %54 : vector<16x512xf32>
    %56 = vector.broadcast %44 : vector<1x512xf32> to vector<16x512xf32>
    %57 = arith.mulf %55, %56 : vector<16x512xf32>
    %58 = vector.extract_strided_slice %57 {offsets = [0, 0], sizes = [16, 128], strides = [1, 1]} : vector<16x512xf32> to vector<16x128xf32>
    %59 = vector.extract_strided_slice %57 {offsets = [0, 128], sizes = [16, 128], strides = [1, 1]} : vector<16x512xf32> to vector<16x128xf32>
    %60 = arith.addf %58, %59 : vector<16x128xf32>
    %61 = vector.extract_strided_slice %57 {offsets = [0, 256], sizes = [16, 128], strides = [1, 1]} : vector<16x512xf32> to vector<16x128xf32>
    %62 = arith.addf %60, %61 : vector<16x128xf32>
    %63 = vector.extract_strided_slice %57 {offsets = [0, 384], sizes = [16, 128], strides = [1, 1]} : vector<16x512xf32> to vector<16x128xf32>
    %64 = arith.addf %62, %63 : vector<16x128xf32>
    %65 = arith.addf %36, %64 : vector<16x128xf32>
    %c2_i32 = arith.constant 2 : i32
    %c512_i32_10 = arith.constant 512 : i32
    %66 = arith.muli %c2_i32, %c512_i32_10 : i32
    %67 = tpu.assume_multiple %66, 512 : i32
    %c0_11 = arith.constant 0 : index
    %68 = arith.index_cast %67 : i32 to index
    %69 = vector.load %arg2[%c0_11, %68] : memref<2x4096xf32, #tpu.memory_space<vmem>>, vector<2x512xf32>
    %c0_12 = arith.constant 0 : index
    %70 = arith.index_cast %67 : i32 to index
    %71 = vector.load %arg3[%c0_12, %70] : memref<1x4096xf32, #tpu.memory_space<vmem>>, vector<1x512xf32>
    %c0_13 = arith.constant 0 : index
    %72 = arith.index_cast %67 : i32 to index
    %73 = vector.load %arg4[%c0_13, %72] : memref<1x4096xf32, #tpu.memory_space<vmem>>, vector<1x512xf32>
    %74 = vector.extract_strided_slice %69 {offsets = [0, 0], sizes = [1, 512], strides = [1, 1]} : vector<2x512xf32> to vector<1x512xf32>
    %75 = vector.broadcast %74 : vector<1x512xf32> to vector<16x512xf32>
    %76 = arith.mulf %3, %75 : vector<16x512xf32>
    %77 = vector.extract_strided_slice %69 {offsets = [1, 0], sizes = [1, 512], strides = [1, 1]} : vector<2x512xf32> to vector<1x512xf32>
    %78 = vector.broadcast %77 : vector<1x512xf32> to vector<16x512xf32>
    %79 = arith.mulf %6, %78 : vector<16x512xf32>
    %80 = arith.addf %76, %79 : vector<16x512xf32>
    %81 = vector.broadcast %71 : vector<1x512xf32> to vector<16x512xf32>
    %82 = arith.addf %80, %81 : vector<16x512xf32>
    %cst_14 = arith.constant 0.000000e+00 : f32
    %83 = vector.broadcast %cst_14 : f32 to vector<16x512xf32>
    %84 = arith.maximumf %82, %83 : vector<16x512xf32>
    %85 = vector.broadcast %73 : vector<1x512xf32> to vector<16x512xf32>
    %86 = arith.mulf %84, %85 : vector<16x512xf32>
    %87 = vector.extract_strided_slice %86 {offsets = [0, 0], sizes = [16, 128], strides = [1, 1]} : vector<16x512xf32> to vector<16x128xf32>
    %88 = vector.extract_strided_slice %86 {offsets = [0, 128], sizes = [16, 128], strides = [1, 1]} : vector<16x512xf32> to vector<16x128xf32>
    %89 = arith.addf %87, %88 : vector<16x128xf32>
    %90 = vector.extract_strided_slice %86 {offsets = [0, 256], sizes = [16, 128], strides = [1, 1]} : vector<16x512xf32> to vector<16x128xf32>
    %91 = arith.addf %89, %90 : vector<16x128xf32>
    %92 = vector.extract_strided_slice %86 {offsets = [0, 384], sizes = [16, 128], strides = [1, 1]} : vector<16x512xf32> to vector<16x128xf32>
    %93 = arith.addf %91, %92 : vector<16x128xf32>
    %94 = arith.addf %65, %93 : vector<16x128xf32>
    %c3_i32 = arith.constant 3 : i32
    %c512_i32_15 = arith.constant 512 : i32
    %95 = arith.muli %c3_i32, %c512_i32_15 : i32
    %96 = tpu.assume_multiple %95, 512 : i32
    %c0_16 = arith.constant 0 : index
    %97 = arith.index_cast %96 : i32 to index
    %98 = vector.load %arg2[%c0_16, %97] : memref<2x4096xf32, #tpu.memory_space<vmem>>, vector<2x512xf32>
    %c0_17 = arith.constant 0 : index
    %99 = arith.index_cast %96 : i32 to index
    %100 = vector.load %arg3[%c0_17, %99] : memref<1x4096xf32, #tpu.memory_space<vmem>>, vector<1x512xf32>
    %c0_18 = arith.constant 0 : index
    %101 = arith.index_cast %96 : i32 to index
    %102 = vector.load %arg4[%c0_18, %101] : memref<1x4096xf32, #tpu.memory_space<vmem>>, vector<1x512xf32>
    %103 = vector.extract_strided_slice %98 {offsets = [0, 0], sizes = [1, 512], strides = [1, 1]} : vector<2x512xf32> to vector<1x512xf32>
    %104 = vector.broadcast %103 : vector<1x512xf32> to vector<16x512xf32>
    %105 = arith.mulf %3, %104 : vector<16x512xf32>
    %106 = vector.extract_strided_slice %98 {offsets = [1, 0], sizes = [1, 512], strides = [1, 1]} : vector<2x512xf32> to vector<1x512xf32>
    %107 = vector.broadcast %106 : vector<1x512xf32> to vector<16x512xf32>
    %108 = arith.mulf %6, %107 : vector<16x512xf32>
    %109 = arith.addf %105, %108 : vector<16x512xf32>
    %110 = vector.broadcast %100 : vector<1x512xf32> to vector<16x512xf32>
    %111 = arith.addf %109, %110 : vector<16x512xf32>
    %cst_19 = arith.constant 0.000000e+00 : f32
    %112 = vector.broadcast %cst_19 : f32 to vector<16x512xf32>
    %113 = arith.maximumf %111, %112 : vector<16x512xf32>
    %114 = vector.broadcast %102 : vector<1x512xf32> to vector<16x512xf32>
    %115 = arith.mulf %113, %114 : vector<16x512xf32>
    %116 = vector.extract_strided_slice %115 {offsets = [0, 0], sizes = [16, 128], strides = [1, 1]} : vector<16x512xf32> to vector<16x128xf32>
    %117 = vector.extract_strided_slice %115 {offsets = [0, 128], sizes = [16, 128], strides = [1, 1]} : vector<16x512xf32> to vector<16x128xf32>
    %118 = arith.addf %116, %117 : vector<16x128xf32>
    %119 = vector.extract_strided_slice %115 {offsets = [0, 256], sizes = [16, 128], strides = [1, 1]} : vector<16x512xf32> to vector<16x128xf32>
    %120 = arith.addf %118, %119 : vector<16x128xf32>
    %121 = vector.extract_strided_slice %115 {offsets = [0, 384], sizes = [16, 128], strides = [1, 1]} : vector<16x512xf32> to vector<16x128xf32>
    %122 = arith.addf %120, %121 : vector<16x128xf32>
    %123 = arith.addf %94, %122 : vector<16x128xf32>
    %c4_i32 = arith.constant 4 : i32
    %c512_i32_20 = arith.constant 512 : i32
    %124 = arith.muli %c4_i32, %c512_i32_20 : i32
    %125 = tpu.assume_multiple %124, 512 : i32
    %c0_21 = arith.constant 0 : index
    %126 = arith.index_cast %125 : i32 to index
    %127 = vector.load %arg2[%c0_21, %126] : memref<2x4096xf32, #tpu.memory_space<vmem>>, vector<2x512xf32>
    %c0_22 = arith.constant 0 : index
    %128 = arith.index_cast %125 : i32 to index
    %129 = vector.load %arg3[%c0_22, %128] : memref<1x4096xf32, #tpu.memory_space<vmem>>, vector<1x512xf32>
    %c0_23 = arith.constant 0 : index
    %130 = arith.index_cast %125 : i32 to index
    %131 = vector.load %arg4[%c0_23, %130] : memref<1x4096xf32, #tpu.memory_space<vmem>>, vector<1x512xf32>
    %132 = vector.extract_strided_slice %127 {offsets = [0, 0], sizes = [1, 512], strides = [1, 1]} : vector<2x512xf32> to vector<1x512xf32>
    %133 = vector.broadcast %132 : vector<1x512xf32> to vector<16x512xf32>
    %134 = arith.mulf %3, %133 : vector<16x512xf32>
    %135 = vector.extract_strided_slice %127 {offsets = [1, 0], sizes = [1, 512], strides = [1, 1]} : vector<2x512xf32> to vector<1x512xf32>
    %136 = vector.broadcast %135 : vector<1x512xf32> to vector<16x512xf32>
    %137 = arith.mulf %6, %136 : vector<16x512xf32>
    %138 = arith.addf %134, %137 : vector<16x512xf32>
    %139 = vector.broadcast %129 : vector<1x512xf32> to vector<16x512xf32>
    %140 = arith.addf %138, %139 : vector<16x512xf32>
    %cst_24 = arith.constant 0.000000e+00 : f32
    %141 = vector.broadcast %cst_24 : f32 to vector<16x512xf32>
    %142 = arith.maximumf %140, %141 : vector<16x512xf32>
    %143 = vector.broadcast %131 : vector<1x512xf32> to vector<16x512xf32>
    %144 = arith.mulf %142, %143 : vector<16x512xf32>
    %145 = vector.extract_strided_slice %144 {offsets = [0, 0], sizes = [16, 128], strides = [1, 1]} : vector<16x512xf32> to vector<16x128xf32>
    %146 = vector.extract_strided_slice %144 {offsets = [0, 128], sizes = [16, 128], strides = [1, 1]} : vector<16x512xf32> to vector<16x128xf32>
    %147 = arith.addf %145, %146 : vector<16x128xf32>
    %148 = vector.extract_strided_slice %144 {offsets = [0, 256], sizes = [16, 128], strides = [1, 1]} : vector<16x512xf32> to vector<16x128xf32>
    %149 = arith.addf %147, %148 : vector<16x128xf32>
    %150 = vector.extract_strided_slice %144 {offsets = [0, 384], sizes = [16, 128], strides = [1, 1]} : vector<16x512xf32> to vector<16x128xf32>
    %151 = arith.addf %149, %150 : vector<16x128xf32>
    %152 = arith.addf %123, %151 : vector<16x128xf32>
    %c5_i32 = arith.constant 5 : i32
    %c512_i32_25 = arith.constant 512 : i32
    %153 = arith.muli %c5_i32, %c512_i32_25 : i32
    %154 = tpu.assume_multiple %153, 512 : i32
    %c0_26 = arith.constant 0 : index
    %155 = arith.index_cast %154 : i32 to index
    %156 = vector.load %arg2[%c0_26, %155] : memref<2x4096xf32, #tpu.memory_space<vmem>>, vector<2x512xf32>
    %c0_27 = arith.constant 0 : index
    %157 = arith.index_cast %154 : i32 to index
    %158 = vector.load %arg3[%c0_27, %157] : memref<1x4096xf32, #tpu.memory_space<vmem>>, vector<1x512xf32>
    %c0_28 = arith.constant 0 : index
    %159 = arith.index_cast %154 : i32 to index
    %160 = vector.load %arg4[%c0_28, %159] : memref<1x4096xf32, #tpu.memory_space<vmem>>, vector<1x512xf32>
    %161 = vector.extract_strided_slice %156 {offsets = [0, 0], sizes = [1, 512], strides = [1, 1]} : vector<2x512xf32> to vector<1x512xf32>
    %162 = vector.broadcast %161 : vector<1x512xf32> to vector<16x512xf32>
    %163 = arith.mulf %3, %162 : vector<16x512xf32>
    %164 = vector.extract_strided_slice %156 {offsets = [1, 0], sizes = [1, 512], strides = [1, 1]} : vector<2x512xf32> to vector<1x512xf32>
    %165 = vector.broadcast %164 : vector<1x512xf32> to vector<16x512xf32>
    %166 = arith.mulf %6, %165 : vector<16x512xf32>
    %167 = arith.addf %163, %166 : vector<16x512xf32>
    %168 = vector.broadcast %158 : vector<1x512xf32> to vector<16x512xf32>
    %169 = arith.addf %167, %168 : vector<16x512xf32>
    %cst_29 = arith.constant 0.000000e+00 : f32
    %170 = vector.broadcast %cst_29 : f32 to vector<16x512xf32>
    %171 = arith.maximumf %169, %170 : vector<16x512xf32>
    %172 = vector.broadcast %160 : vector<1x512xf32> to vector<16x512xf32>
    %173 = arith.mulf %171, %172 : vector<16x512xf32>
    %174 = vector.extract_strided_slice %173 {offsets = [0, 0], sizes = [16, 128], strides = [1, 1]} : vector<16x512xf32> to vector<16x128xf32>
    %175 = vector.extract_strided_slice %173 {offsets = [0, 128], sizes = [16, 128], strides = [1, 1]} : vector<16x512xf32> to vector<16x128xf32>
    %176 = arith.addf %174, %175 : vector<16x128xf32>
    %177 = vector.extract_strided_slice %173 {offsets = [0, 256], sizes = [16, 128], strides = [1, 1]} : vector<16x512xf32> to vector<16x128xf32>
    %178 = arith.addf %176, %177 : vector<16x128xf32>
    %179 = vector.extract_strided_slice %173 {offsets = [0, 384], sizes = [16, 128], strides = [1, 1]} : vector<16x512xf32> to vector<16x128xf32>
    %180 = arith.addf %178, %179 : vector<16x128xf32>
    %181 = arith.addf %152, %180 : vector<16x128xf32>
    %c6_i32 = arith.constant 6 : i32
    %c512_i32_30 = arith.constant 512 : i32
    %182 = arith.muli %c6_i32, %c512_i32_30 : i32
    %183 = tpu.assume_multiple %182, 512 : i32
    %c0_31 = arith.constant 0 : index
    %184 = arith.index_cast %183 : i32 to index
    %185 = vector.load %arg2[%c0_31, %184] : memref<2x4096xf32, #tpu.memory_space<vmem>>, vector<2x512xf32>
    %c0_32 = arith.constant 0 : index
    %186 = arith.index_cast %183 : i32 to index
    %187 = vector.load %arg3[%c0_32, %186] : memref<1x4096xf32, #tpu.memory_space<vmem>>, vector<1x512xf32>
    %c0_33 = arith.constant 0 : index
    %188 = arith.index_cast %183 : i32 to index
    %189 = vector.load %arg4[%c0_33, %188] : memref<1x4096xf32, #tpu.memory_space<vmem>>, vector<1x512xf32>
    %190 = vector.extract_strided_slice %185 {offsets = [0, 0], sizes = [1, 512], strides = [1, 1]} : vector<2x512xf32> to vector<1x512xf32>
    %191 = vector.broadcast %190 : vector<1x512xf32> to vector<16x512xf32>
    %192 = arith.mulf %3, %191 : vector<16x512xf32>
    %193 = vector.extract_strided_slice %185 {offsets = [1, 0], sizes = [1, 512], strides = [1, 1]} : vector<2x512xf32> to vector<1x512xf32>
    %194 = vector.broadcast %193 : vector<1x512xf32> to vector<16x512xf32>
    %195 = arith.mulf %6, %194 : vector<16x512xf32>
    %196 = arith.addf %192, %195 : vector<16x512xf32>
    %197 = vector.broadcast %187 : vector<1x512xf32> to vector<16x512xf32>
    %198 = arith.addf %196, %197 : vector<16x512xf32>
    %cst_34 = arith.constant 0.000000e+00 : f32
    %199 = vector.broadcast %cst_34 : f32 to vector<16x512xf32>
    %200 = arith.maximumf %198, %199 : vector<16x512xf32>
    %201 = vector.broadcast %189 : vector<1x512xf32> to vector<16x512xf32>
    %202 = arith.mulf %200, %201 : vector<16x512xf32>
    %203 = vector.extract_strided_slice %202 {offsets = [0, 0], sizes = [16, 128], strides = [1, 1]} : vector<16x512xf32> to vector<16x128xf32>
    %204 = vector.extract_strided_slice %202 {offsets = [0, 128], sizes = [16, 128], strides = [1, 1]} : vector<16x512xf32> to vector<16x128xf32>
    %205 = arith.addf %203, %204 : vector<16x128xf32>
    %206 = vector.extract_strided_slice %202 {offsets = [0, 256], sizes = [16, 128], strides = [1, 1]} : vector<16x512xf32> to vector<16x128xf32>
    %207 = arith.addf %205, %206 : vector<16x128xf32>
    %208 = vector.extract_strided_slice %202 {offsets = [0, 384], sizes = [16, 128], strides = [1, 1]} : vector<16x512xf32> to vector<16x128xf32>
    %209 = arith.addf %207, %208 : vector<16x128xf32>
    %210 = arith.addf %181, %209 : vector<16x128xf32>
    %c7_i32 = arith.constant 7 : i32
    %c512_i32_35 = arith.constant 512 : i32
    %211 = arith.muli %c7_i32, %c512_i32_35 : i32
    %212 = tpu.assume_multiple %211, 512 : i32
    %c0_36 = arith.constant 0 : index
    %213 = arith.index_cast %212 : i32 to index
    %214 = vector.load %arg2[%c0_36, %213] : memref<2x4096xf32, #tpu.memory_space<vmem>>, vector<2x512xf32>
    %c0_37 = arith.constant 0 : index
    %215 = arith.index_cast %212 : i32 to index
    %216 = vector.load %arg3[%c0_37, %215] : memref<1x4096xf32, #tpu.memory_space<vmem>>, vector<1x512xf32>
    %c0_38 = arith.constant 0 : index
    %217 = arith.index_cast %212 : i32 to index
    %218 = vector.load %arg4[%c0_38, %217] : memref<1x4096xf32, #tpu.memory_space<vmem>>, vector<1x512xf32>
    %219 = vector.extract_strided_slice %214 {offsets = [0, 0], sizes = [1, 512], strides = [1, 1]} : vector<2x512xf32> to vector<1x512xf32>
    %220 = vector.broadcast %219 : vector<1x512xf32> to vector<16x512xf32>
    %221 = arith.mulf %3, %220 : vector<16x512xf32>
    %222 = vector.extract_strided_slice %214 {offsets = [1, 0], sizes = [1, 512], strides = [1, 1]} : vector<2x512xf32> to vector<1x512xf32>
    %223 = vector.broadcast %222 : vector<1x512xf32> to vector<16x512xf32>
    %224 = arith.mulf %6, %223 : vector<16x512xf32>
    %225 = arith.addf %221, %224 : vector<16x512xf32>
    %226 = vector.broadcast %216 : vector<1x512xf32> to vector<16x512xf32>
    %227 = arith.addf %225, %226 : vector<16x512xf32>
    %cst_39 = arith.constant 0.000000e+00 : f32
    %228 = vector.broadcast %cst_39 : f32 to vector<16x512xf32>
    %229 = arith.maximumf %227, %228 : vector<16x512xf32>
    %230 = vector.broadcast %218 : vector<1x512xf32> to vector<16x512xf32>
    %231 = arith.mulf %229, %230 : vector<16x512xf32>
    %232 = vector.extract_strided_slice %231 {offsets = [0, 0], sizes = [16, 128], strides = [1, 1]} : vector<16x512xf32> to vector<16x128xf32>
    %233 = vector.extract_strided_slice %231 {offsets = [0, 128], sizes = [16, 128], strides = [1, 1]} : vector<16x512xf32> to vector<16x128xf32>
    %234 = arith.addf %232, %233 : vector<16x128xf32>
    %235 = vector.extract_strided_slice %231 {offsets = [0, 256], sizes = [16, 128], strides = [1, 1]} : vector<16x512xf32> to vector<16x128xf32>
    %236 = arith.addf %234, %235 : vector<16x128xf32>
    %237 = vector.extract_strided_slice %231 {offsets = [0, 384], sizes = [16, 128], strides = [1, 1]} : vector<16x512xf32> to vector<16x128xf32>
    %238 = arith.addf %236, %237 : vector<16x128xf32>
    %239 = arith.addf %210, %238 : vector<16x128xf32>
    %c8_i32 = arith.constant 8 : i32
    %cst_40 = arith.constant dense<0.000000e+00> : vector<16xf32>
    %240 = vector.multi_reduction <add>, %239, %cst_40 [1] : vector<16x128xf32> to vector<16xf32>
    %241 = vector.shape_cast %240 : vector<16xf32> to vector<16x1xf32>
    %c0_41 = arith.constant 0 : index
    %c0_42 = arith.constant 0 : index
    %242 = memref.load %arg5[%c0_41, %c0_42] : memref<1x1xf32, #tpu.memory_space<smem>>
    %243 = vector.broadcast %242 : f32 to vector<16x1xf32>
    %244 = arith.addf %241, %243 : vector<16x1xf32>
    %c0_43 = arith.constant 0 : index
    %c0_44 = arith.constant 0 : index
    %245 = vector.load %arg6[%c0_43, %c0_44] : memref<16x1xf32, #tpu.memory_space<vmem>>, vector<16x1xf32>
    tpu.vector_store %arg6[%c0_43, %c0_44], %244 {strides = array<i32>} : memref<16x1xf32, #tpu.memory_space<vmem>>, vector<16x1xf32>,
    return
  }
  func.func @transform_0(%arg0: i32) -> (i32, i32) {
    %c0_i32 = arith.constant 0 : i32
    %c0_i32_0 = arith.constant 0 : i32
    return %arg0, %c0_i32 : i32, i32
  }
  func.func @transform_1(%arg0: i32) -> (i32, i32) {
    %c0_i32 = arith.constant 0 : i32
    %c0_i32_0 = arith.constant 0 : i32
    %c0_i32_1 = arith.constant 0 : i32
    return %c0_i32, %c0_i32_0 : i32, i32
  }
  func.func @transform_2(%arg0: i32) -> (i32, i32) {
    %c0_i32 = arith.constant 0 : i32
    %c0_i32_0 = arith.constant 0 : i32
    %c0_i32_1 = arith.constant 0 : i32
    return %c0_i32, %c0_i32_0 : i32, i32
  }
  func.func @transform_3(%arg0: i32) -> (i32, i32) {
    %c0_i32 = arith.constant 0 : i32
    %c0_i32_0 = arith.constant 0 : i32
    %c0_i32_1 = arith.constant 0 : i32
    return %c0_i32, %c0_i32_0 : i32, i32
  }
  func.func @transform_4(%arg0: i32) -> (i32, i32) {
    %c0_i32 = arith.constant 0 : i32
    %c0_i32_0 = arith.constant 0 : i32
    %c0_i32_1 = arith.constant 0 : i32
    return %c0_i32, %c0_i32_0 : i32, i32
  }
  func.func @transform_5(%arg0: i32) -> (i32, i32) {
    %c0_i32 = arith.constant 0 : i32
    %c0_i32_0 = arith.constant 0 : i32
    return %arg0, %c0_i32 : i32, i32
  }
}

</mosaic_0001>

<bundles_post_ra>
// kernel: mlp_forward.1
= control target key start
LH: loop header
LB: loop body
LE: loop exit
PB: predicated region body
PF: predicated region fallthrough
CT: control target
= control target key end

     0   :  { %11 = vsyncpa [#allocation4], 0  ;;  %s2510_s0 = inlined_call_operand.vmem [shape: f32[16,2], index: 0, kind: input, shape index: {}]   ;;  %s2511_s1 = inlined_call_operand.hbm [shape: f32[2,4096], index: 1, kind: input, shape index: {}]   ;;  %s2512_s2 = inlined_call_operand.vmem [shape: f32[1,4096], index: 2, kind: input, shape index: {}]   ;;  %s2513_s3 = inlined_call_operand.hbm [shape: f32[1,4096], index: 3, kind: input, shape index: {}]   ;;  %s2514_s4 = inlined_call_operand.<no memory space> [shape: f32[1,1], index: 4, kind: input, shape index: {}]   ;;  %s2515_s5 = inlined_call_operand.vmem [shape: f32[16,1], index: 5, kind: output, shape index: {}]  }
   0x1   :  { %12 = vsyncpa [#allocation6], 0  ;;  %s1557_s18 = smov [#allocation3]   ;;  %s1558_s20 = smov [#allocation5]  }
   0x2   :  { %s21_s19 = sshll.u32 %s1557_s18, 4  ;;  %s33_s21 = sshll.u32 %s1558_s20, 4  ;;  %s22_s19 = int_to_ptr.vmem [resolvable:$true] %s21_s19  ;;  %s34_s21 = int_to_ptr.vmem [resolvable:$true] %s33_s21 }
   0x3   :  { %s1509_s24 = scalar_lea.hbm %s2511_s1, 1024 }
   0x4   :  { %p1510_p0 = scmp.ne.s32.totalorder %s2511_s1, %s1509_s24  ;;  %p1513_p1 = scmp.lt.u32.totalorder %s1509_s24, %s2511_s1 }
   0x6   :  { %p1515_p2 = pnand %p1513_p1, %p1510_p0 }
   0x8   :  { %1518 = shalt.err (!%p1515_p2)
}
   0x9   :  { %s1519_s29 = scalar_lea.vmem %s22_s19, 1024  ;;  %p1524_p4 = scmp.lt.s32.totalorder %s22_s19, %s22_s19 }
   0xa   :  { %p1520_p3 = scmp.ne.s32.totalorder %s22_s19, %s1519_s29  ;;  %p1525_p5 = scmp.lt.s32.totalorder %s1519_s29, %s1519_s29 }
   0xc   :  { %p1526_p6 = por %p1525_p5, %p1524_p4 }
   0xe   :  { %p1527_p7 = pnand %p1526_p6, %p1520_p3 }
  0x10   :  { %1530 = shalt.err (!%p1527_p7)
}
  0x11   :  { %24 = dma.hbm_to_vmem [thread:$0]  %s2511_s1, 1024, %s22_s19, [#allocation4]  }
  0x12   :  { %s1531_s9 = scalar_lea.hbm %s2513_s3, 512 }
  0x13   :  { %p1532_p8 = scmp.ne.s32.totalorder %s2513_s3, %s1531_s9  ;;  %p1535_p9 = scmp.lt.u32.totalorder %s1531_s9, %s2513_s3 }
  0x15   :  { %p1537_p10 = pnand %p1535_p9, %p1532_p8 }
  0x17   :  { %1540 = shalt.err (!%p1537_p10)
}
  0x18   :  { %s1541_s14 = scalar_lea.vmem %s34_s21, 512  ;;  %p1546_p12 = scmp.lt.s32.totalorder %s34_s21, %s34_s21 }
  0x19   :  { %p1542_p11 = scmp.ne.s32.totalorder %s34_s21, %s1541_s14  ;;  %p1547_p13 = scmp.lt.s32.totalorder %s1541_s14, %s1541_s14 }
  0x1b   :  { %p1548_p0 = por %p1547_p13, %p1546_p12 }
  0x1d   :  { %p1549_p1 = pnand %p1548_p0, %p1542_p11 }
  0x1f   :  { %1552 = shalt.err (!%p1549_p1)
}
  0x20   :  { %36 = dma.hbm_to_vmem [thread:$0]  %s2513_s3, 512, %s34_s21, [#allocation6]  }
  0x21   :  { %1553 = dma.done.wait [#allocation4], 1024  }
  0x22   :  { %1554 = vsyncadd [#allocation4], 4294966272 }
  0x23   :  { %1555 = dma.done.wait [#allocation6], 512  }
  0x24   :  { %1556 = vsyncadd [#allocation6], 4294966784  ;;  %v1559_v0 = vmov 1   ;;  %v1560_v1 = vmov 0   ;;  %v45_v2 = vld [vmem:[%s2510_s0] sm:$0xff]  ;;  %v46_v3 = vld [vmem:[%s2510_s0 + $0x8] sm:$0xff]  ;;  %v69_v4 = vlaneseq }
  0x25   :  { %1507 = vset.pattern.permute.xlu1 %v1559_v0  ;;  %1506 = vset.pattern.permute.xlu0 %v1560_v1  ;;  %v65_v10 = vld [vmem:[#allocation3] sm:$0xff]  ;;  %v240_v23 = vld [vmem:[#allocation3 + $0x8] sm:$0xff]  ;;  %v417_v51 = vld [vmem:[#allocation3 + $0x10] sm:$0xff]  ;;  %vm1486_vm0 = vcmask 7168  }
  0x26   :  { %58 = vperm.xlu1 %1507, %v45_v2   ;;  %49 = vperm.xlu0 %1506, %v45_v2   ;;  %v70_v5 = vshrl.u32 %v69_v4, 7  ;;  %v66_v24 = vld [vmem:[%s2512_s2] sm:$0xf]  ;;  %v1495_v46 = vld [vmem:[%s2512_s2 + $0x4] sm:$0xf] }
  0x27   :  { %v67_v29 = vld [vmem:[#allocation5] sm:$0xf]  ;;  %v244_v60 = vld [vmem:[#allocation5 + $0x4] sm:$0xf] }
  0x28   :  { %v1621_v6 = vsub.s32 0, %v70_v5  ;;  %v1623_v7 = vsub.s32 2, %v70_v5  ;;  %v1625_v8 = vsub.s32 4, %v70_v5  ;;  %v1627_v9 = vsub.s32 6, %v70_v5 }
  0x29   :  { %v1629_v11 = vsub.s32 1, %v70_v5  ;;  %v1631_v12 = vsub.s32 3, %v70_v5  ;;  %v1633_v13 = vsub.s32 5, %v70_v5  ;;  %v1635_v14 = vsub.s32 7, %v70_v5 }
  0x2a   :  { %62 = vperm.xlu1 %1507, %v46_v3   ;;  %54 = vperm.xlu0 %1506, %v46_v3   ;;  %v72_v15 = vrot.slane %v65_v10, %v1621_v6  ;;  %v76_v16 = vrot.slane %v65_v10, %v1623_v7  ;;  %v80_v17 = vrot.slane %v65_v10, %v1625_v8 }
  0x2b   :  { %v84_v18 = vrot.slane %v65_v10, %v1627_v9  ;;  %v116_v19 = vrot.slane %v65_v10, %v1629_v11  ;;  %v120_v20 = vrot.slane %v65_v10, %v1631_v12  ;;  %v124_v21 = vrot.slane %v65_v10, %v1633_v13 }
  0x2c   :  { %v128_v22 = vrot.slane %v65_v10, %v1635_v14  ;;  %v1649_v25 = vrot.slane %v72_v15, %v1621_v6  ;;  %v1652_v26 = vrot.slane %v76_v16, %v1621_v6  ;;  %v1655_v27 = vrot.slane %v80_v17, %v1621_v6  ;;  %v594_v17 = vld [vmem:[#allocation3 + $0x18] sm:$0xff] }
  0x2d   :  { %v1658_v28 = vrot.slane %v84_v18, %v1621_v6  ;;  %v1661_v30 = vrot.slane %v116_v19, %v1629_v11  ;;  %v1664_v31 = vrot.slane %v120_v20, %v1629_v11  ;;  %v249_v32 = vrot.slane %v240_v23, %v1621_v6 }
  0x2e   :  { %1508 = vset.pattern.permute.xlu0 %v1559_v0  ;;  %2627 = vst [vmem:[#allocation9_spill] sm:$0xff] %v1655_v27  ;;  %v253_v33 = vrot.slane %v240_v23, %v1623_v7  ;;  %v1669_v34 = vrot.slane %v124_v21, %v1629_v11  ;;  %v1672_v35 = vrot.slane %v128_v22, %v1629_v11  ;;  %v1496_v22 = vld [vmem:[%s2512_s2 + $0x8] sm:$0xf] }
  0x2f   :  { %2628 = vst [vmem:[#allocation10_spill] sm:$0xff] %v1658_v28  ;;  %2629 = vst [vmem:[#allocation11_spill] sm:$0xff] %v1661_v30  ;;  %v257_v36 = vrot.slane %v240_v23, %v1625_v8  ;;  %v261_v37 = vrot.slane %v240_v23, %v1627_v9  ;;  %v1677_v38 = vrot.slane %v66_v24, %v1621_v6 }
  0x30   :  { %2630 = vst [vmem:[#allocation12_spill] sm:$0xff] %v1664_v31  ;;  %2631 = vst [vmem:[#allocation13_spill] sm:$0xff] %v1669_v34  ;;  %v1680_v39 = vrot.slane %v66_v24, %v1629_v11  ;;  %v293_v40 = vrot.slane %v240_v23, %v1629_v11  ;;  %v297_v41 = vrot.slane %v240_v23, %v1631_v12 }
  0x31   :  { %2632 = vst [vmem:[#allocation14_spill] sm:$0xff] %v1672_v35  ;;  %v1685_v42 = vrot.slane %v66_v24, %v1623_v7  ;;  %v1688_v43 = vrot.slane %v66_v24, %v1631_v12  ;;  %v1691_v44 = vrot.slane %v67_v29, %v1621_v6  ;;  %v1694_v45 = vrot.slane %v67_v29, %v1629_v11 }
  0x32   :  { %v1700_v47 = vrot.slane %v67_v29, %v1623_v7  ;;  %v1703_v48 = vrot.slane %v67_v29, %v1631_v12  ;;  %v1706_v49 = vrot.slane %v249_v32, %v1621_v6  ;;  %v1709_v50 = vrot.slane %v253_v33, %v1621_v6 }
  0x33   :  { %v1712_v52 = vrot.slane %v257_v36, %v1621_v6  ;;  %v1715_v53 = vrot.slane %v261_v37, %v1621_v6  ;;  %v301_v54 = vrot.slane %v240_v23, %v1633_v13  ;;  %v305_v55 = vrot.slane %v240_v23, %v1635_v14 }
  0x34   :  { %2633 = vst [vmem:[#allocation15_spill] sm:$0xff] %v1703_v48  ;;  %2634 = vst [vmem:[#allocation16_spill] sm:$0xff] %v1706_v49  ;;  %v1720_v56 = vrot.slane %v293_v40, %v1629_v11  ;;  %v1723_v57 = vrot.slane %v297_v41, %v1629_v11  ;;  %v1726_v58 = vrot.slane %v1495_v46, %v1621_v6  ;;  %v421_v41 = vld [vmem:[#allocation5 + $0x8] sm:$0xf] }
  0x35   :  { %2635 = vst [vmem:[#allocation17_spill] sm:$0xff] %v1709_v50  ;;  %2636 = vst [vmem:[#allocation18_spill] sm:$0xff] %v1712_v52  ;;  %v1729_v59 = vrot.slane %v1495_v46, %v1629_v11  ;;  %v426_v61 = vrot.slane %v417_v51, %v1621_v6  ;;  %v430_v62 = vrot.slane %v417_v51, %v1623_v7 }
  0x36   :  { %2637 = vst [vmem:[#allocation19_spill] sm:$0xff] %v1715_v53  ;;  %2638 = vst [vmem:[#allocation20_spill] sm:$0xff] %v1720_v56  ;;  %v434_v63 = vrot.slane %v417_v51, %v1625_v8  ;;  %v438_v0 = vrot.slane %v417_v51, %v1627_v9  ;;  %v1736_v1 = vrot.slane %v1495_v46, %v1623_v7 }
  0x37   :  { %2639 = vst [vmem:[#allocation21_spill] sm:$0xff] %v1723_v57  ;;  %v1739_v2 = vrot.slane %v1495_v46, %v1631_v12  ;;  %v470_v3 = vrot.slane %v417_v51, %v1629_v11  ;;  %v474_v4 = vrot.slane %v417_v51, %v1631_v12  ;;  %v1744_v5 = vrot.slane %v301_v54, %v1629_v11 }
  0x38   :  { %v1747_v10 = vrot.slane %v305_v55, %v1629_v11  ;;  %v478_v15 = vrot.slane %v417_v51, %v1633_v13  ;;  %v482_v16 = vrot.slane %v417_v51, %v1635_v14  ;;  %v1752_v18 = vrot.slane %v244_v60, %v1621_v6 }
  0x39   :  { %2640 = vst [vmem:[#allocation22_spill] sm:$0xff] %v1744_v5  ;;  %v1755_v19 = vrot.slane %v244_v60, %v1629_v11  ;;  %v1758_v20 = vrot.slane %v244_v60, %v1623_v7  ;;  %v1761_v21 = vrot.slane %v244_v60, %v1631_v12  ;;  %v1767_v23 = vrot.slane %v426_v61, %v1621_v6 }
  0x3a   :  { %2641 = vst [vmem:[#allocation23_spill] sm:$0xff] %v1747_v10  ;;  %2642 = vst [vmem:[#allocation24_spill] sm:$0xff] %v1752_v18  ;;  %v1770_v24 = vrot.slane %v430_v62, %v1621_v6  ;;  %v1773_v29 = vrot.slane %v434_v63, %v1621_v6  ;;  %v1776_v32 = vrot.slane %v438_v0, %v1621_v6  ;;  %v771_v0 = vld [vmem:[#allocation3 + $0x20] sm:$0xff] }
  0x3b   :  { %2643 = vst [vmem:[#allocation25_spill] sm:$0xff] %v1755_v19  ;;  %2644 = vst [vmem:[#allocation26_spill] sm:$0xff] %v1758_v20  ;;  %v1779_v33 = vrot.slane %v470_v3, %v1629_v11  ;;  %v1782_v36 = vrot.slane %v474_v4, %v1629_v11  ;;  %v603_v37 = vrot.slane %v594_v17, %v1621_v6 }
  0x3c   :  { %2645 = vst [vmem:[#allocation27_spill] sm:$0xff] %v1761_v21  ;;  %2646 = vst [vmem:[#allocation28_spill] sm:$0xff] %v1773_v29  ;;  %v607_v40 = vrot.slane %v594_v17, %v1623_v7  ;;  %v1787_v46 = vrot.slane %v478_v15, %v1629_v11  ;;  %v1790_v51 = vrot.slane %v482_v16, %v1629_v11 }
  0x3d   :  { %2647 = vst [vmem:[#allocation29_spill] sm:$0xff] %v1776_v32  ;;  %2648 = vst [vmem:[#allocation30_spill] sm:$0xff] %v1779_v33  ;;  %v1793_v54 = vrot.slane %v1496_v22, %v1621_v6  ;;  %v1796_v55 = vrot.slane %v1496_v22, %v1629_v11  ;;  %v611_v60 = vrot.slane %v594_v17, %v1625_v8 }
  0x3e   :  { %2649 = vst [vmem:[#allocation31_spill] sm:$0xff] %v1782_v36  ;;  %2650 = vst [vmem:[#allocation32_spill] sm:$0xff] %v1787_v46  ;;  %v615_v61 = vrot.slane %v594_v17, %v1627_v9  ;;  %v647_v62 = vrot.slane %v594_v17, %v1629_v11  ;;  %v651_v63 = vrot.slane %v594_v17, %v1631_v12 }
  0x3f   :  { %2651 = vst [vmem:[#allocation33_spill] sm:$0xff] %v1790_v51  ;;  %2652 = vst [vmem:[#allocation34_spill] sm:$0xff] %v1793_v54  ;;  %v1803_v3 = vrot.slane %v1496_v22, %v1623_v7  ;;  %v1806_v4 = vrot.slane %v1496_v22, %v1631_v12  ;;  %v655_v15 = vrot.slane %v594_v17, %v1633_v13 }
  0x40   :  { %2653 = vst [vmem:[#allocation35_spill] sm:$0xff] %v1796_v55  ;;  %v659_v16 = vrot.slane %v594_v17, %v1635_v14  ;;  %v1811_v55 = vrot.slane %v421_v41, %v1621_v6  ;;  %v1814_v54 = vrot.slane %v421_v41, %v1629_v11  ;;  %v1817_v51 = vrot.slane %v603_v37, %v1621_v6  ;;  %v1497_v17 = vld [vmem:[%s2512_s2 + $0xc] sm:$0xf] }
  0x41   :  { %2654 = vst [vmem:[#allocation36_spill] sm:$0xff] %v1803_v3  ;;  %2655 = vst [vmem:[#allocation37_spill] sm:$0xff] %v1806_v4  ;;  %v1820_v46 = vrot.slane %v607_v40, %v1621_v6  ;;  %v1823_v3 = vrot.slane %v421_v41, %v1623_v7  ;;  %v1826_v22 = vrot.slane %v421_v41, %v1631_v12 }
  0x42   :  { %2656 = vst [vmem:[#allocation38_spill] sm:$0xff] %v1811_v55  ;;  %2657 = vst [vmem:[#allocation39_spill] sm:$0xff] %v1814_v54  ;;  %v780_v55 = vrot.slane %v771_v0, %v1621_v6  ;;  %v784_v54 = vrot.slane %v771_v0, %v1623_v7  ;;  %v1834_v37 = vrot.slane %v611_v60, %v1621_v6 }
  0x43   :  { %2658 = vst [vmem:[#allocation40_spill] sm:$0xff] %v1817_v51  ;;  %2659 = vst [vmem:[#allocation41_spill] sm:$0xff] %v1820_v46  ;;  %v1837_v40 = vrot.slane %v615_v61, %v1621_v6  ;;  %v1840_v4 = vrot.slane %v647_v62, %v1629_v11  ;;  %v1843_v41 = vrot.slane %v651_v63, %v1629_v11 }
  0x44   :  { %2660 = vst [vmem:[#allocation42_spill] sm:$0xff] %v1823_v3  ;;  %2661 = vst [vmem:[#allocation43_spill] sm:$0xff] %v1826_v22  ;;  %v598_v22 = vld [vmem:[#allocation5 + $0xc] sm:$0xf]  ;;  %v1846_v3 = vrot.slane %v655_v15, %v1629_v11  ;;  %v1849_v46 = vrot.slane %v659_v16, %v1629_v11  ;;  %v788_v51 = vrot.slane %v771_v0, %v1625_v8 }
  0x45   :  { %2662 = vst [vmem:[#allocation44_spill] sm:$0xff] %v1834_v37  ;;  %2663 = vst [vmem:[#allocation45_spill] sm:$0xff] %v1837_v40  ;;  %v792_v60 = vrot.slane %v771_v0, %v1627_v9  ;;  %v1854_v61 = vrot.slane %v1497_v17, %v1621_v6  ;;  %v1857_v62 = vrot.slane %v1497_v17, %v1629_v11 }
  0x46   :  { %2664 = vst [vmem:[#allocation46_spill] sm:$0xff] %v1840_v4  ;;  %2665 = vst [vmem:[#allocation47_spill] sm:$0xff] %v1843_v41  ;;  %v824_v63 = vrot.slane %v771_v0, %v1629_v11  ;;  %v828_v41 = vrot.slane %v771_v0, %v1631_v12  ;;  %v1862_v15 = vrot.slane %v1497_v17, %v1623_v7 }
  0x47   :  { %2666 = vst [vmem:[#allocation48_spill] sm:$0xff] %v1846_v3  ;;  %2667 = vst [vmem:[#allocation49_spill] sm:$0xff] %v1849_v46  ;;  %v1865_v16 = vrot.slane %v1497_v17, %v1631_v12  ;;  %v1868_v46 = vrot.slane %v780_v55, %v1621_v6  ;;  %v1871_v3 = vrot.slane %v784_v54, %v1621_v6  ;;  %v1498_v54 = vld [vmem:[%s2512_s2 + $0x10] sm:$0xf] }
  0x48   :  { %2668 = vst [vmem:[#allocation50_spill] sm:$0xff] %v1854_v61  ;;  %2669 = vst [vmem:[#allocation51_spill] sm:$0xff] %v1857_v62  ;;  %v948_v61 = vld [vmem:[#allocation3 + $0x28] sm:$0xff]  ;;  %v1874_v4 = vrot.slane %v598_v22, %v1621_v6  ;;  %v1877_v62 = vrot.slane %v598_v22, %v1629_v11  ;;  %v832_v40 = vrot.slane %v771_v0, %v1633_v13 }
  0x49   :  { %2670 = vst [vmem:[#allocation52_spill] sm:$0xff] %v1862_v15  ;;  %2671 = vst [vmem:[#allocation53_spill] sm:$0xff] %v1865_v16  ;;  %v836_v15 = vrot.slane %v771_v0, %v1635_v14  ;;  %v1882_v17 = vrot.slane %v598_v22, %v1623_v7  ;;  %v1885_v55 = vrot.slane %v598_v22, %v1631_v12 }
  0x4a   :  { %2672 = vst [vmem:[#allocation54_spill] sm:$0xff] %v1868_v46  ;;  %2673 = vst [vmem:[#allocation55_spill] sm:$0xff] %v1871_v3  ;;  %v1891_v3 = vrot.slane %v788_v51, %v1621_v6  ;;  %v1900_v0 = vrot.slane %v828_v41, %v1629_v11  ;;  %v961_v22 = vrot.slane %v948_v61, %v1623_v7 }
  0x4b   :  { %2674 = vst [vmem:[#allocation56_spill] sm:$0xff] %v1874_v4  ;;  %2675 = vst [vmem:[#allocation57_spill] sm:$0xff] %v1877_v62  ;;  %v1894_v4 = vrot.slane %v792_v60, %v1621_v6  ;;  %v1897_v62 = vrot.slane %v824_v63, %v1629_v11  ;;  %v969_v16 = vrot.slane %v948_v61, %v1627_v9  ;;  %v1125_v60 = vld [vmem:[#allocation3 + $0x30] sm:$0xff] }
  0x4c   :  { %2676 = vst [vmem:[#allocation58_spill] sm:$0xff] %v1882_v17  ;;  %2677 = vst [vmem:[#allocation59_spill] sm:$0xff] %v1885_v55  ;;  %v957_v17 = vrot.slane %v948_v61, %v1621_v6  ;;  %v965_v55 = vrot.slane %v948_v61, %v1625_v8  ;;  %v1001_v51 = vrot.slane %v948_v61, %v1629_v11 }
  0x4d   :  { %2678 = vst [vmem:[#allocation60_spill] sm:$0xff] %v1891_v3  ;;  %2679 = vst [vmem:[#allocation61_spill] sm:$0xff] %v1894_v4  ;;  %v1005_v3 = vrot.slane %v948_v61, %v1631_v12  ;;  %v1909_v4 = vrot.slane %v832_v40, %v1629_v11  ;;  %v1912_v63 = vrot.slane %v836_v15, %v1629_v11 }
  0x4e   :  { %2680 = vst [vmem:[#allocation62_spill] sm:$0xff] %v1897_v62  ;;  %2681 = vst [vmem:[#allocation63_spill] sm:$0xff] %v1900_v0  ;;  %v1915_v41 = vrot.slane %v1498_v54, %v1621_v6  ;;  %v1918_v0 = vrot.slane %v1498_v54, %v1629_v11  ;;  %v775_v62 = vld [vmem:[#allocation5 + $0x10] sm:$0xf]  ;;  %v1921_v46 = vrot.slane %v1498_v54, %v1623_v7 }
  0x4f   :  { %2682 = vst [vmem:[#allocation64_spill] sm:$0xff] %v1909_v4  ;;  %2683 = vst [vmem:[#allocation65_spill] sm:$0xff] %v1912_v63  ;;  %v1924_v37 = vrot.slane %v1498_v54, %v1631_v12  ;;  %v1009_v36 = vrot.slane %v948_v61, %v1633_v13  ;;  %v1013_v40 = vrot.slane %v948_v61, %v1635_v14 }
  0x50   :  { %2684 = vst [vmem:[#allocation66_spill] sm:$0xff] %v1915_v41  ;;  %2685 = vst [vmem:[#allocation67_spill] sm:$0xff] %v1918_v0  ;;  %v1929_v15 = vrot.slane %v957_v17, %v1621_v6  ;;  %v1932_v63 = vrot.slane %v961_v22, %v1621_v6  ;;  %v1134_v41 = vrot.slane %v1125_v60, %v1621_v6 }
  0x51   :  { %2686 = vst [vmem:[#allocation68_spill] sm:$0xff] %v1921_v46  ;;  %2687 = vst [vmem:[#allocation69_spill] sm:$0xff] %v1924_v37  ;;  %v1138_v0 = vrot.slane %v1125_v60, %v1623_v7  ;;  %v1937_v4 = vrot.slane %v965_v55, %v1621_v6  ;;  %v1940_v54 = vrot.slane %v969_v16, %v1621_v6  ;;  %v1499_v55 = vld [vmem:[%s2512_s2 + $0x14] sm:$0xf] }
  0x52   :  { %2688 = vst [vmem:[#allocation70_spill] sm:$0xff] %v1929_v15  ;;  %2689 = vst [vmem:[#allocation71_spill] sm:$0xff] %v1932_v63  ;;  %v1943_v37 = vrot.slane %v1001_v51, %v1629_v11  ;;  %v1946_v61 = vrot.slane %v1005_v3, %v1629_v11  ;;  %v1949_v17 = vrot.slane %v775_v62, %v1621_v6  ;;  %v952_v63 = vld [vmem:[#allocation5 + $0x14] sm:$0xf] }
  0x53   :  { %2690 = vst [vmem:[#allocation72_spill] sm:$0xff] %v1937_v4  ;;  %2691 = vst [vmem:[#allocation73_spill] sm:$0xff] %v1940_v54  ;;  %v1952_v22 = vrot.slane %v775_v62, %v1629_v11  ;;  %v1142_v4 = vrot.slane %v1125_v60, %v1625_v8  ;;  %v1146_v16 = vrot.slane %v1125_v60, %v1627_v9 }
  0x54   :  { %2692 = vst [vmem:[#allocation74_spill] sm:$0xff] %v1943_v37  ;;  %2693 = vst [vmem:[#allocation75_spill] sm:$0xff] %v1946_v61  ;;  %v1960_v51 = vrot.slane %v775_v62, %v1623_v7  ;;  %v1963_v3 = vrot.slane %v775_v62, %v1631_v12  ;;  %v1966_v61 = vrot.slane %v1009_v36, %v1629_v11 }
  0x55   :  { %2694 = vst [vmem:[#allocation76_spill] sm:$0xff] %v1949_v17  ;;  %2695 = vst [vmem:[#allocation77_spill] sm:$0xff] %v1952_v22  ;;  %v1969_v17 = vrot.slane %v1013_v40, %v1629_v11  ;;  %v1972_v22 = vrot.slane %v1134_v41, %v1621_v6  ;;  %v1975_v37 = vrot.slane %v1138_v0, %v1621_v6 }
  0x56   :  { %2696 = vst [vmem:[#allocation78_spill] sm:$0xff] %v1960_v51  ;;  %2697 = vst [vmem:[#allocation79_spill] sm:$0xff] %v1963_v3  ;;  %v1178_v54 = vrot.slane %v1125_v60, %v1629_v11  ;;  %v1182_v46 = vrot.slane %v1125_v60, %v1631_v12  ;;  %v1302_v51 = vld [vmem:[#allocation3 + $0x38] sm:$0xff]  ;;  %v1980_v62 = vrot.slane %v1499_v55, %v1621_v6 }
  0x57   :  { %2698 = vst [vmem:[#allocation80_spill] sm:$0xff] %v1966_v61  ;;  %2699 = vst [vmem:[#allocation81_spill] sm:$0xff] %v1969_v17  ;;  %v1983_v36 = vrot.slane %v1499_v55, %v1629_v11  ;;  %v1986_v40 = vrot.slane %v1499_v55, %v1623_v7  ;;  %v1989_v41 = vrot.slane %v1499_v55, %v1631_v12 }
  0x58   :  { %2700 = vst [vmem:[#allocation82_spill] sm:$0xff] %v1972_v22  ;;  %2701 = vst [vmem:[#allocation83_spill] sm:$0xff] %v1975_v37  ;;  %v1992_v0 = vrot.slane %v1142_v4, %v1621_v6  ;;  %v1995_v37 = vrot.slane %v1146_v16, %v1621_v6  ;;  %v1186_v22 = vrot.slane %v1125_v60, %v1633_v13 }
  0x59   :  { %2702 = vst [vmem:[#allocation84_spill] sm:$0xff] %v1980_v62  ;;  %2703 = vst [vmem:[#allocation85_spill] sm:$0xff] %v1983_v36  ;;  %v1190_v3 = vrot.slane %v1125_v60, %v1635_v14  ;;  %v1311_v62 = vrot.slane %v1302_v51, %v1621_v6  ;;  %v1315_v36 = vrot.slane %v1302_v51, %v1623_v7  ;;  %v1500_v60 = vld [vmem:[%s2512_s2 + $0x18] sm:$0xf] }
  0x5a   :  { %2704 = vst [vmem:[#allocation86_spill] sm:$0xff] %v1986_v40  ;;  %2705 = vst [vmem:[#allocation87_spill] sm:$0xff] %v1989_v41  ;;  %v1319_v17 = vrot.slane %v1302_v51, %v1625_v8  ;;  %v1323_v40 = vrot.slane %v1302_v51, %v1627_v9  ;;  %v2004_v55 = vrot.slane %v952_v63, %v1621_v6 }
  0x5b   :  { %2706 = vst [vmem:[#allocation88_spill] sm:$0xff] %v1992_v0  ;;  %2707 = vst [vmem:[#allocation89_spill] sm:$0xff] %v1995_v37  ;;  %v2007_v4 = vrot.slane %v952_v63, %v1629_v11  ;;  %v2010_v16 = vrot.slane %v1178_v54, %v1629_v11  ;;  %v2013_v37 = vrot.slane %v1182_v46, %v1629_v11 }
  0x5c   :  { %2708 = vst [vmem:[#allocation90_spill] sm:$0xff] %v2004_v55  ;;  %v1355_v8 = vrot.slane %v1302_v51, %v1629_v11  ;;  %v1359_v9 = vrot.slane %v1302_v51, %v1631_v12  ;;  %v1363_v0 = vrot.slane %v1302_v51, %v1633_v13  ;;  %v1367_v55 = vrot.slane %v1302_v51, %v1635_v14 }
  0x5d   :  { %2709 = vst [vmem:[#allocation91_spill] sm:$0xff] %v2007_v4  ;;  %2710 = vst [vmem:[#allocation92_spill] sm:$0xff] %v2010_v16  ;;  %v2023_v4 = vrot.slane %v952_v63, %v1623_v7  ;;  %v2026_v54 = vrot.slane %v952_v63, %v1631_v12  ;;  %v2029_v46 = vrot.slane %v1186_v22, %v1629_v11  ;;  %v1129_v16 = vld [vmem:[#allocation5 + $0x18] sm:$0xf] }
  0x5e   :  { %2711 = vst [vmem:[#allocation93_spill] sm:$0xff] %v2013_v37  ;;  %v2032_v37 = vrot.slane %v1190_v3, %v1629_v11  ;;  %v2035_v41 = vrot.slane %v1311_v62, %v1621_v6  ;;  %v2038_v13 = vrot.slane %v1315_v36, %v1621_v6  ;;  %v2041_v14 = vrot.slane %v1319_v17, %v1621_v6  ;;  %v1501_v17 = vld [vmem:[%s2512_s2 + $0x1c] sm:$0xf] }
  0x5f   :  { %2712 = vst [vmem:[#allocation94_spill] sm:$0xff] %v2023_v4  ;;  %2713 = vst [vmem:[#allocation95_spill] sm:$0xff] %v2026_v54  ;;  %v2044_v51 = vrot.slane %v1323_v40, %v1621_v6  ;;  %v2047_v63 = vrot.slane %v1500_v60, %v1621_v6  ;;  %v2050_v22 = vrot.slane %v1500_v60, %v1629_v11  ;;  %v1306_v36 = vld [vmem:[#allocation5 + $0x1c] sm:$0xf] }
  0x60   :  { %2714 = vst [vmem:[#allocation96_spill] sm:$0xff] %v2029_v46  ;;  %2715 = vst [vmem:[#allocation97_spill] sm:$0xff] %v2032_v37  ;;  %v2053_v3 = vrot.slane %v1500_v60, %v1623_v7  ;;  %v2056_v62 = vrot.slane %v1500_v60, %v1631_v12  ;;  %v2062_v40 = vrot.slane %v1355_v8, %v1629_v11 }
  0x61   :  { %2716 = vst [vmem:[#allocation98_spill] sm:$0xff] %v2038_v13  ;;  %2717 = vst [vmem:[#allocation99_spill] sm:$0xff] %v2041_v14  ;;  %v2068_v14 = vrot.slane %v1363_v0, %v1629_v11  ;;  %v2074_v60 = vrot.slane %v1129_v16, %v1621_v6  ;;  %v2083_v8 = vrot.slane %v1129_v16, %v1631_v12 }
  0x62   :  { %2718 = vst [vmem:[#allocation100_spill] sm:$0xff] %v2044_v51  ;;  %2719 = vst [vmem:[#allocation101_spill] sm:$0xff] %v2050_v22  ;;  %v2065_v51 = vrot.slane %v1359_v9, %v1629_v11  ;;  %v2071_v22 = vrot.slane %v1367_v55, %v1629_v11  ;;  %v2086_v9 = vrot.slane %v1501_v17, %v1621_v6 }
  0x63   :  { %2720 = vst [vmem:[#allocation102_spill] sm:$0xff] %v2053_v3  ;;  %2721 = vst [vmem:[#allocation103_spill] sm:$0xff] %v2056_v62  ;;  %v2077_v62 = vrot.slane %v1129_v16, %v1629_v11  ;;  %v2080_v3 = vrot.slane %v1129_v16, %v1623_v7  ;;  %v2089_v0 = vrot.slane %v1501_v17, %v1629_v11 }
  0x64   :  { %2722 = vst [vmem:[#allocation104_spill] sm:$0xff] %v2062_v40  ;;  %2723 = vst [vmem:[#allocation105_spill] sm:$0xff] %v2065_v51  ;;  %v2092_v55 = vrot.slane %v1501_v17, %v1623_v7  ;;  %v2105_v16 = vrot.slane %v1306_v36, %v1629_v11 }
  0x65   :  { %2724 = vst [vmem:[#allocation106_spill] sm:$0xff] %v2068_v14  ;;  %2725 = vst [vmem:[#allocation107_spill] sm:$0xff] %v2071_v22  ;;  %v2095_v22 = vrot.slane %v1501_v17, %v1631_v12 }
  0x66   :  { %2726 = vst [vmem:[#allocation108_spill] sm:$0xff] %v2074_v60  ;;  %2727 = vst [vmem:[#allocation109_spill] sm:$0xff] %v2077_v62 }
  0x67   :  { %2728 = vst [vmem:[#allocation110_spill] sm:$0xff] %v2080_v3  ;;  %2729 = vst [vmem:[#allocation111_spill] sm:$0xff] %v2083_v8  ;;  %v2102_v3 = vrot.slane %v1306_v36, %v1621_v6 }
  0x68   :  { %2730 = vst [vmem:[#allocation112_spill] sm:$0xff] %v2086_v9  ;;  %2731 = vst [vmem:[#allocation113_spill] sm:$0xff] %v2089_v0  ;;  %v2108_v9 = vrot.slane %v1306_v36, %v1623_v7  ;;  %v2111_v0 = vrot.slane %v1306_v36, %v1631_v12 }
  0x69   :  { %2732 = vst [vmem:[#allocation114_spill] sm:$0xff] %v2092_v55  ;;  %2733 = vst [vmem:[#allocation115_spill] sm:$0xff] %v2095_v22 }
  0x6a   :  { %2734 = vst [vmem:[#allocation116_spill] sm:$0xff] %v2102_v3  ;;  %2735 = vst [vmem:[#allocation117_spill] sm:$0xff] %v2105_v16 }
  0x6b   :  { %2736 = vst [vmem:[#allocation118_spill] sm:$0xff] %v2108_v9  ;;  %2737 = vst [vmem:[#allocation119_spill] sm:$0xff] %v2111_v0 }
  0xa5   :  { %v2097_v14 = vpop.permute.xlu1 %58  ;;  %v2099_v62 = vpop.permute.xlu0 %49 }
  0xa6   :  { %v105_v17 = vmul.f32 %v1649_v25, %v2099_v62  ;;  %v106_v22 = vmul.f32 %v1652_v26, %v2099_v62  ;;  %v107_v55 = vmul.f32 %v1655_v27, %v2099_v62  ;;  %v108_v6 = vmul.f32 %v1658_v28, %v2099_v62 }
  0xa7   :  { %v149_v11 = vmul.f32 %v1661_v30, %v2097_v14  ;;  %v150_v7 = vmul.f32 %v1664_v31, %v2097_v14  ;;  %v151_v12 = vmul.f32 %v1669_v34, %v2097_v14  ;;  %v152_v36 = vmul.f32 %v1672_v35, %v2097_v14 }
  0xa8   :  { %v282_v0 = vmul.f32 %v1706_v49, %v2099_v62  ;;  %v283_v9 = vmul.f32 %v1709_v50, %v2099_v62  ;;  %v284_v16 = vmul.f32 %v1712_v52, %v2099_v62  ;;  %v285_v3 = vmul.f32 %v1715_v53, %v2099_v62 }
  0xa9   :  { %v157_v30 = vadd.f32 %v149_v11, %v105_v17  ;;  %v158_v31 = vadd.f32 %v150_v7, %v106_v22  ;;  %v159_v28 = vadd.f32 %v151_v12, %v107_v55  ;;  %v160_v27 = vadd.f32 %v152_v36, %v108_v6 }
  0xaa   :  { %v326_v34 = vmul.f32 %v1720_v56, %v2097_v14  ;;  %v327_v35 = vmul.f32 %v1723_v57, %v2097_v14  ;;  %v328_v49 = vmul.f32 %v1744_v5, %v2097_v14  ;;  %v329_v50 = vmul.f32 %v1747_v10, %v2097_v14 }
  0xab   :  { %v186_v52 = vadd.f32 %v1677_v38, %v157_v30  ;;  %v187_v53 = vadd.f32 %v1680_v39, %v158_v31  ;;  %v188_v22 = vadd.f32 %v1685_v42, %v159_v28  ;;  %v189_v55 = vadd.f32 %v1688_v43, %v160_v27 }
  0xac   :  { %v334_v17 = vadd.f32 %v326_v34, %v282_v0  ;;  %v335_v6 = vadd.f32 %v327_v35, %v283_v9  ;;  %v336_v11 = vadd.f32 %v328_v49, %v284_v16  ;;  %v337_v7 = vadd.f32 %v329_v50, %v285_v3 }
  0xad   :  { %v194_v12 = vmax.f32 %v186_v52, 0.0  ;;  %v195_v36 = vmax.f32 %v187_v53, 0.0  ;;  %v196_v57 = vmax.f32 %v188_v22, 0.0  ;;  %v197_v56 = vmax.f32 %v189_v55, 0.0 }
  0xae   :  { %v363_v5 = vadd.f32 %v1726_v58, %v334_v17  ;;  %v364_v10 = vadd.f32 %v1729_v59, %v335_v6  ;;  %v365_v30 = vadd.f32 %v1736_v1, %v336_v11  ;;  %v366_v31 = vadd.f32 %v1739_v2, %v337_v7  ;;  %v2738_v6 = vld [vmem:[#allocation31_spill] sm:$0xff] }
  0xaf   :  { %v223_v28 = vmul.f32 %v1691_v44, %v194_v12  ;;  %v224_v27 = vmul.f32 %v1694_v45, %v195_v36  ;;  %v225_v34 = vmul.f32 %v1700_v47, %v196_v57  ;;  %v226_v35 = vmul.f32 %v1703_v48, %v197_v56  ;;  %v2739_v12 = vld [vmem:[#allocation32_spill] sm:$0xff] }
  0xb0   :  { %v371_v49 = vmax.f32 %v363_v5, 0.0  ;;  %v372_v50 = vmax.f32 %v364_v10, 0.0  ;;  %v373_v52 = vmax.f32 %v365_v30, 0.0  ;;  %v374_v53 = vmax.f32 %v366_v31, 0.0  ;;  %v2740_v30 = vld [vmem:[#allocation33_spill] sm:$0xff] }
  0xb1   :  { %v231_v3 = vadd.f32 %v224_v27, %v223_v28  ;;  %v459_v9 = vmul.f32 %v1767_v23, %v2099_v62  ;;  %v460_v0 = vmul.f32 %v1770_v24, %v2099_v62  ;;  %v461_v16 = vmul.f32 %v1773_v29, %v2099_v62  ;;  %v2741_v28 = vld [vmem:[#allocation40_spill] sm:$0xff]  ;;  %v2758_v29 = vld [vmem:[#allocation51_spill] sm:$0xff] }
  0xb2   :  { %v400_v22 = vmul.f32 %v1752_v18, %v371_v49  ;;  %v401_v57 = vmul.f32 %v1755_v19, %v372_v50  ;;  %v402_v56 = vmul.f32 %v1758_v20, %v373_v52  ;;  %v403_v5 = vmul.f32 %v1761_v21, %v374_v53  ;;  %v2742_v52 = vld [vmem:[#allocation41_spill] sm:$0xff]  ;;  %v2744_v19 = vld [vmem:[#allocation34_spill] sm:$0xff]  ;;  %v2745_v18 = vld [vmem:[#allocation35_spill] sm:$0xff] }
  0xb3   :  { %v233_v10 = vadd.f32 %v231_v3, %v225_v34  ;;  %v462_v55 = vmul.f32 %v1776_v32, %v2099_v62  ;;  %v503_v17 = vmul.f32 %v1779_v33, %v2097_v14  ;;  %v504_v11 = vmul.f32 %v2738_v6, %v2097_v14  ;;  %v2757_v33 = vld [vmem:[#allocation50_spill] sm:$0xff] }
  0xb4   :  { %v408_v7 = vadd.f32 %v401_v57, %v400_v22  ;;  %v505_v36 = vmul.f32 %v2739_v12, %v2097_v14  ;;  %v506_v31 = vmul.f32 %v2740_v30, %v2097_v14  ;;  %v636_v27 = vmul.f32 %v2741_v28, %v2099_v62  ;;  %v2743_v22 = vld [vmem:[#allocation44_spill] sm:$0xff]  ;;  %v2746_v30 = vld [vmem:[#allocation45_spill] sm:$0xff] }
  0xb5   :  { %v235_v34 = vadd.f32 %v233_v10, %v226_v35  ;;  %v511_v49 = vadd.f32 %v503_v17, %v459_v9  ;;  %v512_v50 = vadd.f32 %v504_v11, %v460_v0  ;;  %v637_v53 = vmul.f32 %v2742_v52, %v2099_v62  ;;  %v2747_v35 = vld [vmem:[#allocation46_spill] sm:$0xff]  ;;  %v2748_v10 = vld [vmem:[#allocation36_spill] sm:$0xff]  ;;  %v2749_v11 = vld [vmem:[#allocation37_spill] sm:$0xff] }
  0xb6   :  { %v410_v3 = vadd.f32 %v408_v7, %v402_v56  ;;  %v513_v21 = vadd.f32 %v505_v36, %v461_v16  ;;  %v514_v20 = vadd.f32 %v506_v31, %v462_v55  ;;  %v638_v57 = vmul.f32 %v2743_v22, %v2099_v62  ;;  %v2750_v16 = vld [vmem:[#allocation47_spill] sm:$0xff]  ;;  %v2751_v31 = vld [vmem:[#allocation48_spill] sm:$0xff] }
  0xb7   :  { %v540_v12 = vadd.f32 %v2744_v19, %v511_v49  ;;  %v541_v6 = vadd.f32 %v2745_v18, %v512_v50  ;;  %v639_v48 = vmul.f32 %v2746_v30, %v2099_v62  ;;  %v680_v9 = vmul.f32 %v2747_v35, %v2097_v14  ;;  %v2752_v50 = vld [vmem:[#allocation49_spill] sm:$0xff]  ;;  %v2755_v19 = vld [vmem:[#allocation42_spill] sm:$0xff] }
  0xb8   :  { %v412_v0 = vadd.f32 %v410_v3, %v403_v5  ;;  %v542_v17 = vadd.f32 %v2748_v10, %v513_v21  ;;  %v543_v56 = vadd.f32 %v2749_v11, %v514_v20  ;;  %v681_v55 = vmul.f32 %v2750_v16, %v2097_v14  ;;  %v2753_v5 = vld [vmem:[#allocation38_spill] sm:$0xff]  ;;  %v2754_v21 = vld [vmem:[#allocation39_spill] sm:$0xff] }
  0xb9   :  { %v548_v7 = vmax.f32 %v540_v12, 0.0  ;;  %v549_v36 = vmax.f32 %v541_v6, 0.0  ;;  %v682_v49 = vmul.f32 %v2751_v31, %v2097_v14  ;;  %v683_v22 = vmul.f32 %v2752_v50, %v2097_v14  ;;  %v2756_v12 = vld [vmem:[#allocation43_spill] sm:$0xff] }
  0xba   :  { %v414_v30 = vadd.f32 %v412_v0, %v235_v34  ;;  %v550_v52 = vmax.f32 %v542_v17, 0.0  ;;  %v551_v18 = vmax.f32 %v543_v56, 0.0  ;;  %v688_v35 = vadd.f32 %v680_v9, %v636_v27  ;;  %v2759_v34 = vld [vmem:[#allocation52_spill] sm:$0xff]  ;;  %v2760_v27 = vld [vmem:[#allocation54_spill] sm:$0xff]  ;;  %v2761_v17 = vld [vmem:[#allocation53_spill] sm:$0xff] }
  0xbb   :  { %v577_v3 = vmul.f32 %v2753_v5, %v548_v7  ;;  %v578_v10 = vmul.f32 %v2754_v21, %v549_v36  ;;  %v689_v20 = vadd.f32 %v681_v55, %v637_v53  ;;  %v690_v11 = vadd.f32 %v682_v49, %v638_v57  ;;  %v2762_v53 = vld [vmem:[#allocation55_spill] sm:$0xff] }
  0xbc   :  { %v579_v16 = vmul.f32 %v2755_v19, %v550_v52  ;;  %v580_v6 = vmul.f32 %v2756_v12, %v551_v18  ;;  %v691_v28 = vadd.f32 %v683_v22, %v639_v48  ;;  %v717_v31 = vadd.f32 %v2757_v33, %v688_v35  ;;  %v2763_v52 = vld [vmem:[#allocation60_spill] sm:$0xff] }
  0xbd   :  { %v585_v32 = vadd.f32 %v578_v10, %v577_v3  ;;  %v718_v50 = vadd.f32 %v2758_v29, %v689_v20  ;;  %v719_v0 = vadd.f32 %v2759_v34, %v690_v11  ;;  %v813_v9 = vmul.f32 %v2760_v27, %v2099_v62  ;;  %v2764_v10 = vld [vmem:[#allocation61_spill] sm:$0xff]  ;;  %v2765_v11 = vld [vmem:[#allocation56_spill] sm:$0xff]  ;;  %v2766_v3 = vld [vmem:[#allocation62_spill] sm:$0xff] }
  0xbe   :  { %v720_v56 = vadd.f32 %v2761_v17, %v691_v28  ;;  %v725_v7 = vmax.f32 %v717_v31, 0.0  ;;  %v814_v57 = vmul.f32 %v2762_v53, %v2099_v62  ;;  %v815_v18 = vmul.f32 %v2763_v52, %v2099_v62  ;;  %v2767_v28 = vld [vmem:[#allocation63_spill] sm:$0xff]  ;;  %v2768_v17 = vld [vmem:[#allocation57_spill] sm:$0xff]  ;;  %v2769_v53 = vld [vmem:[#allocation58_spill] sm:$0xff] }
  0xbf   :  { %v587_v48 = vadd.f32 %v585_v32, %v579_v16  ;;  %v726_v22 = vmax.f32 %v718_v50, 0.0  ;;  %v727_v35 = vmax.f32 %v719_v0, 0.0  ;;  %v816_v55 = vmul.f32 %v2764_v10, %v2099_v62  ;;  %v2770_v32 = vld [vmem:[#allocation64_spill] sm:$0xff]  ;;  %v2771_v50 = vld [vmem:[#allocation59_spill] sm:$0xff] }
  0xc0   :  { %v728_v36 = vmax.f32 %v720_v56, 0.0  ;;  %v754_v49 = vmul.f32 %v2765_v11, %v725_v7  ;;  %v857_v20 = vmul.f32 %v2766_v3, %v2097_v14  ;;  %v858_v31 = vmul.f32 %v2767_v28, %v2097_v14  ;;  %v2772_v56 = vld [vmem:[#allocation65_spill] sm:$0xff] }
  0xc1   :  { %v589_v12 = vadd.f32 %v587_v48, %v580_v6  ;;  %v755_v34 = vmul.f32 %v2768_v17, %v726_v22  ;;  %v756_v52 = vmul.f32 %v2769_v53, %v727_v35  ;;  %v859_v16 = vmul.f32 %v2770_v32, %v2097_v14  ;;  %v2773_v22 = vld [vmem:[#allocation66_spill] sm:$0xff]  ;;  %v2774_v35 = vld [vmem:[#allocation67_spill] sm:$0xff] }
  0xc2   :  { %v757_v0 = vmul.f32 %v2771_v50, %v728_v36  ;;  %v860_v10 = vmul.f32 %v2772_v56, %v2097_v14  ;;  %v865_v7 = vadd.f32 %v857_v20, %v813_v9  ;;  %v866_v11 = vadd.f32 %v858_v31, %v814_v57  ;;  %v2775_v32 = vld [vmem:[#allocation71_spill] sm:$0xff]  ;;  %v2776_v50 = vld [vmem:[#allocation68_spill] sm:$0xff] }
  0xc3   :  { %v591_v27 = vadd.f32 %v589_v12, %v414_v30  ;;  %v762_v3 = vadd.f32 %v755_v34, %v754_v49  ;;  %v867_v29 = vadd.f32 %v859_v16, %v815_v18  ;;  %v990_v6 = vmul.f32 %v1929_v15, %v2099_v62  ;;  %v2777_v9 = vld [vmem:[#allocation72_spill] sm:$0xff]  ;;  %v2778_v30 = vld [vmem:[#allocation73_spill] sm:$0xff]  ;;  %v2781_v16 = vld [vmem:[#allocation75_spill] sm:$0xff] }
  0xc4   :  { %v868_v48 = vadd.f32 %v860_v10, %v816_v55  ;;  %v894_v17 = vadd.f32 %v2773_v22, %v865_v7  ;;  %v895_v53 = vadd.f32 %v2774_v35, %v866_v11  ;;  %v991_v28 = vmul.f32 %v2775_v32, %v2099_v62  ;;  %v2779_v34 = vld [vmem:[#allocation69_spill] sm:$0xff]  ;;  %v2780_v55 = vld [vmem:[#allocation74_spill] sm:$0xff]  ;;  %v2782_v7 = vld [vmem:[#allocation76_spill] sm:$0xff] }
  0xc5   :  { %v764_v36 = vadd.f32 %v762_v3, %v756_v52  ;;  %v896_v33 = vadd.f32 %v2776_v50, %v867_v29  ;;  %v992_v57 = vmul.f32 %v2777_v9, %v2099_v62  ;;  %v993_v12 = vmul.f32 %v2778_v30, %v2099_v62  ;;  %v2783_v50 = vld [vmem:[#allocation77_spill] sm:$0xff]  ;;  %v2787_v22 = vld [vmem:[#allocation84_spill] sm:$0xff] }
  0xc6   :  { %v897_v18 = vadd.f32 %v2779_v34, %v868_v48  ;;  %v902_v49 = vmax.f32 %v894_v17, 0.0  ;;  %v903_v10 = vmax.f32 %v895_v53, 0.0  ;;  %v1034_v20 = vmul.f32 %v2780_v55, %v2097_v14  ;;  %v2784_v48 = vld [vmem:[#allocation81_spill] sm:$0xff]  ;;  %v2785_v34 = vld [vmem:[#allocation78_spill] sm:$0xff] }
  0xc7   :  { %v766_v11 = vadd.f32 %v764_v36, %v757_v0  ;;  %v904_v31 = vmax.f32 %v896_v33, 0.0  ;;  %v1035_v52 = vmul.f32 %v2781_v16, %v2097_v14  ;;  %v1036_v29 = vmul.f32 %v1966_v61, %v2097_v14  ;;  %v2786_v33 = vld [vmem:[#allocation79_spill] sm:$0xff] }
  0xc8   :  { %v905_v3 = vmax.f32 %v897_v18, 0.0  ;;  %v931_v9 = vmul.f32 %v2782_v7, %v902_v49  ;;  %v932_v30 = vmul.f32 %v2783_v50, %v903_v10  ;;  %v1037_v17 = vmul.f32 %v2784_v48, %v2097_v14  ;;  %v2788_v18 = vld [vmem:[#allocation85_spill] sm:$0xff]  ;;  %v2789_v49 = vld [vmem:[#allocation82_spill] sm:$0xff]  ;;  %v2790_v50 = vld [vmem:[#allocation83_spill] sm:$0xff] }
  0xc9   :  { %v768_v53 = vadd.f32 %v766_v11, %v591_v27  ;;  %v933_v32 = vmul.f32 %v2785_v34, %v904_v31  ;;  %v1042_v55 = vadd.f32 %v1034_v20, %v990_v6  ;;  %v1043_v0 = vadd.f32 %v1035_v52, %v991_v28  ;;  %v2791_v11 = vld [vmem:[#allocation86_spill] sm:$0xff]  ;;  %v2792_v6 = vld [vmem:[#allocation87_spill] sm:$0xff]  ;;  %v2793_v20 = vld [vmem:[#allocation88_spill] sm:$0xff] }
  0xca   :  { %v934_v36 = vmul.f32 %v2786_v33, %v905_v3  ;;  %v939_v15 = vadd.f32 %v932_v30, %v931_v9  ;;  %v1044_v16 = vadd.f32 %v1036_v29, %v992_v57  ;;  %v1045_v35 = vadd.f32 %v1037_v17, %v993_v12  ;;  %v2794_v12 = vld [vmem:[#allocation89_spill] sm:$0xff]  ;;  %v2795_v52 = vld [vmem:[#allocation92_spill] sm:$0xff] }
  0xcb   :  { %v1071_v61 = vadd.f32 %v2787_v22, %v1042_v55  ;;  %v1072_v56 = vadd.f32 %v2788_v18, %v1043_v0  ;;  %v1167_v10 = vmul.f32 %v2789_v49, %v2099_v62  ;;  %v1168_v48 = vmul.f32 %v2790_v50, %v2099_v62 }
  0xcc   :  { %v941_v27 = vadd.f32 %v939_v15, %v933_v32  ;;  %v1073_v31 = vadd.f32 %v2791_v11, %v1044_v16  ;;  %v1074_v28 = vadd.f32 %v2792_v6, %v1045_v35  ;;  %v1169_v9 = vmul.f32 %v2793_v20, %v2099_v62  ;;  %v2796_v15 = vld [vmem:[#allocation93_spill] sm:$0xff]  ;;  %v2797_v16 = vld [vmem:[#allocation90_spill] sm:$0xff]  ;;  %v2798_v35 = vld [vmem:[#allocation91_spill] sm:$0xff] }
  0xcd   :  { %v1079_v57 = vmax.f32 %v1071_v61, 0.0  ;;  %v1080_v30 = vmax.f32 %v1072_v56, 0.0  ;;  %v1170_v55 = vmul.f32 %v2794_v12, %v2099_v62  ;;  %v1211_v29 = vmul.f32 %v2795_v52, %v2097_v14 }
  0xce   :  { %v943_v3 = vadd.f32 %v941_v27, %v934_v36  ;;  %v1081_v17 = vmax.f32 %v1073_v31, 0.0  ;;  %v1082_v0 = vmax.f32 %v1074_v28, 0.0  ;;  %v1212_v32 = vmul.f32 %v2796_v15, %v2097_v14 }
  0xcf   :  { %v1108_v33 = vmul.f32 %v2797_v16, %v1079_v57  ;;  %v1109_v6 = vmul.f32 %v2798_v35, %v1080_v30  ;;  %v1213_v61 = vmul.f32 %v2029_v46, %v2097_v14  ;;  %v1214_v56 = vmul.f32 %v2032_v37, %v2097_v14  ;;  %v2799_v37 = vld [vmem:[#allocation99_spill] sm:$0xff] }
  0xd0   :  { %v945_v12 = vadd.f32 %v943_v3, %v768_v53  ;;  %v1110_v20 = vmul.f32 %v2023_v4, %v1081_v17  ;;  %v1111_v36 = vmul.f32 %v2026_v54, %v1082_v0  ;;  %v1219_v27 = vadd.f32 %v1211_v29, %v1167_v10  ;;  %v2800_v17 = vld [vmem:[#allocation101_spill] sm:$0xff]  ;;  %v2801_v0 = vld [vmem:[#allocation102_spill] sm:$0xff] }
  0xd1   :  { %v1116_v31 = vadd.f32 %v1109_v6, %v1108_v33  ;;  %v1220_v28 = vadd.f32 %v1212_v32, %v1168_v48  ;;  %v1221_v52 = vadd.f32 %v1213_v61, %v1169_v9  ;;  %v1222_v15 = vadd.f32 %v1214_v56, %v1170_v55  ;;  %v2802_v33 = vld [vmem:[#allocation103_spill] sm:$0xff]  ;;  %v2803_v9 = vld [vmem:[#allocation100_spill] sm:$0xff] }
  0xd2   :  { %v1248_v57 = vadd.f32 %v2047_v63, %v1219_v27  ;;  %v1344_v30 = vmul.f32 %v2035_v41, %v2099_v62  ;;  %v1345_v46 = vmul.f32 %v2038_v13, %v2099_v62  ;;  %v1346_v53 = vmul.f32 %v2799_v37, %v2099_v62  ;;  %v2807_v37 = vld [vmem:[#allocation110_spill] sm:$0xff] }
  0xd3   :  { %v1118_v3 = vadd.f32 %v1116_v31, %v1110_v20  ;;  %v1249_v4 = vadd.f32 %v2800_v17, %v1220_v28  ;;  %v1250_v10 = vadd.f32 %v2801_v0, %v1221_v52  ;;  %v1251_v48 = vadd.f32 %v2802_v33, %v1222_v15  ;;  %v2289_v31 = vpop.permute.xlu0 %54  ;;  %v2804_v15 = vld [vmem:[#allocation106_spill] sm:$0xff] }
  0xd4   :  { %v1256_v6 = vmax.f32 %v1248_v57, 0.0  ;;  %v1347_v55 = vmul.f32 %v2803_v9, %v2099_v62  ;;  %v1388_v29 = vmul.f32 %v2062_v40, %v2097_v14  ;;  %v1389_v32 = vmul.f32 %v2065_v51, %v2097_v14  ;;  %v2805_v57 = vld [vmem:[#allocation107_spill] sm:$0xff]  ;;  %v2806_v40 = vld [vmem:[#allocation109_spill] sm:$0xff] }
  0xd5   :  { %v1120_v61 = vadd.f32 %v1118_v3, %v1111_v36  ;;  %v1257_v56 = vmax.f32 %v1249_v4, 0.0  ;;  %v1258_v27 = vmax.f32 %v1250_v10, 0.0  ;;  %v1259_v20 = vmax.f32 %v1251_v48, 0.0  ;;  %v2299_v36 = vpop.permute.xlu1 %62 }
  0xd6   :  { %v1285_v52 = vmul.f32 %v2074_v60, %v1256_v6  ;;  %v1390_v28 = vmul.f32 %v2804_v15, %v2097_v14  ;;  %v1391_v62 = vmul.f32 %v2805_v57, %v2097_v14  ;;  %v1396_v54 = vadd.f32 %v1388_v29, %v1344_v30  ;;  %v2808_v6 = vld [vmem:[#allocation112_spill] sm:$0xff]  ;;  %v2810_v29 = vld [vmem:[#allocation113_spill] sm:$0xff] }
  0xd7   :  { %v1122_v33 = vadd.f32 %v1120_v61, %v945_v12  ;;  %v1286_v9 = vmul.f32 %v2806_v40, %v1257_v56  ;;  %v1287_v51 = vmul.f32 %v2807_v37, %v1258_v27  ;;  %v1288_v4 = vmul.f32 %v2083_v8, %v1259_v20  ;;  %v2809_v12 = vld [vmem:[#allocation9_spill] sm:$0xff]  ;;  %v2811_v56 = vld [vmem:[#allocation114_spill] sm:$0xff]  ;;  %v2812_v20 = vld [vmem:[#allocation115_spill] sm:$0xff] }
  0xd8   :  { %v1397_v3 = vadd.f32 %v1389_v32, %v1345_v46  ;;  %v1398_v10 = vadd.f32 %v1390_v28, %v1346_v53  ;;  %v1399_v48 = vadd.f32 %v1391_v62, %v1347_v55  ;;  %v1425_v60 = vadd.f32 %v2808_v6, %v1396_v54  ;;  %v2813_v54 = vld [vmem:[#allocation10_spill] sm:$0xff]  ;;  %v2814_v32 = vld [vmem:[#allocation11_spill] sm:$0xff]  ;;  %v2816_v8 = vld [vmem:[#allocation116_spill] sm:$0xff] }
  0xd9   :  { %v1293_v13 = vadd.f32 %v1286_v9, %v1285_v52  ;;  %v109_v15 = vmul.f32 %v1649_v25, %v2289_v31  ;;  %v110_v14 = vmul.f32 %v1652_v26, %v2289_v31  ;;  %v111_v30 = vmul.f32 %v2809_v12, %v2289_v31  ;;  %v2815_v52 = vld [vmem:[#allocation12_spill] sm:$0xff]  ;;  %v2821_v37 = vld [vmem:[#allocation119_spill] sm:$0xff] }
  0xda   :  { %v1426_v61 = vadd.f32 %v2810_v29, %v1397_v3  ;;  %v1427_v27 = vadd.f32 %v2811_v56, %v1398_v10  ;;  %v1428_v46 = vadd.f32 %v2812_v20, %v1399_v48  ;;  %v1433_v53 = vmax.f32 %v1425_v60, 0.0  ;;  %v2817_v10 = vld [vmem:[#allocation13_spill] sm:$0xff]  ;;  %v2820_v56 = vld [vmem:[#allocation118_spill] sm:$0xff] }
  0xdb   :  { %v1295_v55 = vadd.f32 %v1293_v13, %v1287_v51  ;;  %v112_v9 = vmul.f32 %v2813_v54, %v2289_v31  ;;  %v153_v25 = vmul.f32 %v2814_v32, %v2299_v36  ;;  %v154_v26 = vmul.f32 %v2815_v52, %v2299_v36  ;;  %v2818_v13 = vld [vmem:[#allocation14_spill] sm:$0xff]  ;;  %v2819_v54 = vld [vmem:[#allocation117_spill] sm:$0xff] }
  0xdc   :  { %v1434_v28 = vmax.f32 %v1426_v61, 0.0  ;;  %v1435_v62 = vmax.f32 %v1427_v27, 0.0  ;;  %v1436_v12 = vmax.f32 %v1428_v46, 0.0  ;;  %v1462_v3 = vmul.f32 %v2816_v8, %v1433_v53 }
  0xdd   :  { %v1297_v29 = vadd.f32 %v1295_v55, %v1288_v4  ;;  %v155_v48 = vmul.f32 %v2817_v10, %v2299_v36  ;;  %v156_v51 = vmul.f32 %v2818_v13, %v2299_v36  ;;  %v161_v60 = vadd.f32 %v153_v25, %v109_v15  ;;  %v2822_v10 = vld [vmem:[#allocation16_spill] sm:$0xff]  ;;  %v2823_v15 = vld [vmem:[#allocation17_spill] sm:$0xff] }
  0xde   :  { %v1463_v20 = vmul.f32 %v2819_v54, %v1434_v28  ;;  %v1464_v32 = vmul.f32 %v2820_v56, %v1435_v62  ;;  %v1465_v6 = vmul.f32 %v2821_v37, %v1436_v12  ;;  %v162_v52 = vadd.f32 %v154_v26, %v110_v14 }
  0xdf   :  { %v1299_v61 = vadd.f32 %v1297_v29, %v1122_v33  ;;  %v163_v27 = vadd.f32 %v155_v48, %v111_v30  ;;  %v164_v46 = vadd.f32 %v156_v51, %v112_v9  ;;  %v190_v53 = vadd.f32 %v1677_v38, %v161_v60  ;;  %v2824_v33 = vld [vmem:[#allocation18_spill] sm:$0xff]  ;;  %v2825_v38 = vld [vmem:[#allocation19_spill] sm:$0xff]  ;;  %v2827_v48 = vld [vmem:[#allocation21_spill] sm:$0xff] }
  0xe0   :  { %v1470_v4 = vadd.f32 %v1463_v20, %v1462_v3  ;;  %v191_v55 = vadd.f32 %v1680_v39, %v162_v52  ;;  %v286_v8 = vmul.f32 %v2822_v10, %v2289_v31  ;;  %v287_v25 = vmul.f32 %v2823_v15, %v2289_v31  ;;  %v2826_v39 = vld [vmem:[#allocation20_spill] sm:$0xff]  ;;  %v2828_v51 = vld [vmem:[#allocation22_spill] sm:$0xff] }
  0xe1   :  { %v192_v28 = vadd.f32 %v1685_v42, %v163_v27  ;;  %v193_v62 = vadd.f32 %v1688_v43, %v164_v46  ;;  %v198_v12 = vmax.f32 %v190_v53, 0.0  ;;  %v288_v14 = vmul.f32 %v2824_v33, %v2289_v31 }
  0xe2   :  { %v1472_v30 = vadd.f32 %v1470_v4, %v1464_v32  ;;  %v199_v29 = vmax.f32 %v191_v55, 0.0  ;;  %v289_v20 = vmul.f32 %v2825_v38, %v2289_v31  ;;  %v330_v9 = vmul.f32 %v2826_v39, %v2299_v36  ;;  %v2829_v32 = vld [vmem:[#allocation23_spill] sm:$0xff]  ;;  %v2835_v39 = vld [vmem:[#allocation24_spill] sm:$0xff] }
  0xe3   :  { %v200_v26 = vmax.f32 %v192_v28, 0.0  ;;  %v227_v3 = vmul.f32 %v1691_v44, %v198_v12  ;;  %v331_v42 = vmul.f32 %v2827_v48, %v2299_v36  ;;  %v332_v60 = vmul.f32 %v2828_v51, %v2299_v36  ;;  %v2839_v51 = vld [vmem:[#allocation26_spill] sm:$0xff] }
  0xe4   :  { %v1474_v13 = vadd.f32 %v1472_v30, %v1465_v6  ;;  %v228_v43 = vmul.f32 %v1694_v45, %v199_v29  ;;  %v333_v52 = vmul.f32 %v2829_v32, %v2299_v36  ;;  %v201_v27 = vmax.f32 %v193_v62, 0.0 }
  0xe5   :  { %v338_v46 = vadd.f32 %v330_v9, %v286_v8  ;;  %v339_v53 = vadd.f32 %v331_v42, %v287_v25  ;;  %v340_v10 = vadd.f32 %v332_v60, %v288_v14  ;;  %v229_v44 = vmul.f32 %v1700_v47, %v200_v26  ;;  %v2836_v9 = vld [vmem:[#allocation25_spill] sm:$0xff] }
  0xe6   :  { %v1476_v4 = vadd.f32 %v1474_v13, %v1299_v61  ;;  %v232_v55 = vadd.f32 %v228_v43, %v227_v3  ;;  %v341_v15 = vadd.f32 %v333_v52, %v289_v20  ;;  %v463_v45 = vmul.f32 %v1767_v23, %v2289_v31  ;;  %v2830_v61 = vld [vmem:[#allocation28_spill] sm:$0xff]  ;;  %v2833_v23 = vld [vmem:[#allocation15_spill] sm:$0xff]  ;;  %v2838_v42 = vld [vmem:[#allocation33_spill] sm:$0xff] }
  0xe7   :  { %v367_v28 = vadd.f32 %v1726_v58, %v338_v46  ;;  %v368_v6 = vadd.f32 %v1729_v59, %v339_v53  ;;  %v369_v12 = vadd.f32 %v1736_v1, %v340_v10  ;;  %v464_v8 = vmul.f32 %v1770_v24, %v2289_v31  ;;  %v2831_v58 = vld [vmem:[#allocation29_spill] sm:$0xff]  ;;  %v2832_v59 = vld [vmem:[#allocation30_spill] sm:$0xff]  ;;  %v2837_v3 = vld [vmem:[#allocation32_spill] sm:$0xff] }
  0xe8   :  { %1478 = vadd.xlane.f32.xlu0 %v1476_v4  ;;  %v370_v62 = vadd.f32 %v1739_v2, %v341_v15  ;;  %v465_v25 = vmul.f32 %v2830_v61, %v2289_v31  ;;  %v466_v14 = vmul.f32 %v2831_v58, %v2289_v31  ;;  %v507_v30 = vmul.f32 %v2832_v59, %v2299_v36  ;;  %v2834_v2 = vld [vmem:[#allocation31_spill] sm:$0xff]  ;;  %v2840_v4 = vld [vmem:[#allocation40_spill] sm:$0xff]  ;;  %v2841_v10 = vld [vmem:[#allocation34_spill] sm:$0xff] }
  0xe9   :  { %v375_v33 = vmax.f32 %v367_v28, 0.0  ;;  %v376_v47 = vmax.f32 %v368_v6, 0.0  ;;  %v230_v29 = vmul.f32 %v2833_v23, %v201_v27  ;;  %v234_v38 = vadd.f32 %v232_v55, %v229_v44  ;;  %v2842_v44 = vld [vmem:[#allocation35_spill] sm:$0xff]  ;;  %v2843_v6 = vld [vmem:[#allocation41_spill] sm:$0xff]  ;;  %v2844_v61 = vld [vmem:[#allocation44_spill] sm:$0xff] }
  0xea   :  { %v377_v1 = vmax.f32 %v369_v12, 0.0  ;;  %v508_v20 = vmul.f32 %v2834_v2, %v2299_v36  ;;  %v509_v48 = vmul.f32 %v2837_v3, %v2299_v36  ;;  %v510_v13 = vmul.f32 %v2838_v42, %v2299_v36  ;;  %v2848_v23 = vld [vmem:[#allocation46_spill] sm:$0xff]  ;;  %v2849_v2 = vld [vmem:[#allocation47_spill] sm:$0xff]  ;;  %v2851_v3 = vld [vmem:[#allocation48_spill] sm:$0xff] }
  0xeb   :  { %v404_v24 = vmul.f32 %v2835_v39, %v375_v33  ;;  %v405_v26 = vmul.f32 %v2836_v9, %v376_v47  ;;  %v378_v43 = vmax.f32 %v370_v62, 0.0  ;;  %v515_v32 = vadd.f32 %v507_v30, %v463_v45  ;;  %v2845_v47 = vld [vmem:[#allocation36_spill] sm:$0xff] }
  0xec   :  { %v406_v60 = vmul.f32 %v2839_v51, %v377_v1  ;;  %v516_v52 = vadd.f32 %v508_v20, %v464_v8  ;;  %v517_v46 = vadd.f32 %v509_v48, %v465_v25  ;;  %v518_v53 = vadd.f32 %v510_v13, %v466_v14  ;;  %v2846_v8 = vld [vmem:[#allocation37_spill] sm:$0xff] }
  0xed   :  { %v409_v27 = vadd.f32 %v405_v26, %v404_v24  ;;  %v640_v55 = vmul.f32 %v2840_v4, %v2289_v31  ;;  %v544_v15 = vadd.f32 %v2841_v10, %v515_v32  ;;  %v641_v12 = vmul.f32 %v2843_v6, %v2289_v31  ;;  %v2847_v25 = vld [vmem:[#allocation45_spill] sm:$0xff]  ;;  %v2850_v24 = vld [vmem:[#allocation27_spill] sm:$0xff]  ;;  %v2853_v4 = vld [vmem:[#allocation50_spill] sm:$0xff] }
  0xee   :  { %v545_v28 = vadd.f32 %v2842_v44, %v516_v52  ;;  %v642_v62 = vmul.f32 %v2844_v61, %v2289_v31  ;;  %v546_v45 = vadd.f32 %v2845_v47, %v517_v46  ;;  %v547_v58 = vadd.f32 %v2846_v8, %v518_v53  ;;  %v2852_v51 = vld [vmem:[#allocation49_spill] sm:$0xff]  ;;  %v2858_v47 = vld [vmem:[#allocation52_spill] sm:$0xff] }
  0xef   :  { %v411_v33 = vadd.f32 %v409_v27, %v406_v60  ;;  %v643_v14 = vmul.f32 %v2847_v25, %v2289_v31  ;;  %v552_v59 = vmax.f32 %v544_v15, 0.0  ;;  %v684_v1 = vmul.f32 %v2848_v23, %v2299_v36  ;;  %v2854_v15 = vld [vmem:[#allocation51_spill] sm:$0xff] }
  0xf0   :  { %v553_v30 = vmax.f32 %v545_v28, 0.0  ;;  %v685_v20 = vmul.f32 %v2849_v2, %v2299_v36  ;;  %v236_v39 = vadd.f32 %v234_v38, %v230_v29  ;;  %v407_v9 = vmul.f32 %v2850_v24, %v378_v43 }
  0xf1   :  { %v554_v26 = vmax.f32 %v546_v45, 0.0  ;;  %v686_v48 = vmul.f32 %v2851_v3, %v2299_v36  ;;  %v581_v42 = vmul.f32 %v2753_v5, %v552_v59  ;;  %v687_v60 = vmul.f32 %v2852_v51, %v2299_v36  ;;  %v2855_v5 = vld [vmem:[#allocation54_spill] sm:$0xff]  ;;  %v2866_v3 = vld [vmem:[#allocation64_spill] sm:$0xff] }
  0xf2   :  { %v582_v13 = vmul.f32 %v2754_v21, %v553_v30  ;;  %v692_v32 = vadd.f32 %v684_v1, %v640_v55  ;;  %v413_v52 = vadd.f32 %v411_v33, %v407_v9  ;;  %v555_v27 = vmax.f32 %v547_v58, 0.0  ;;  %v2856_v21 = vld [vmem:[#allocation55_spill] sm:$0xff]  ;;  %v2857_v55 = vld [vmem:[#allocation60_spill] sm:$0xff]  ;;  %v2860_v58 = vld [vmem:[#allocation61_spill] sm:$0xff] }
  0xf3   :  { %v583_v46 = vmul.f32 %v2755_v19, %v554_v26  ;;  %v693_v53 = vadd.f32 %v685_v20, %v641_v12  ;;  %v694_v38 = vadd.f32 %v686_v48, %v642_v62  ;;  %v695_v43 = vadd.f32 %v687_v60, %v643_v14  ;;  %v2859_v12 = vld [vmem:[#allocation53_spill] sm:$0xff]  ;;  %v2861_v14 = vld [vmem:[#allocation62_spill] sm:$0xff]  ;;  %v2862_v30 = vld [vmem:[#allocation63_spill] sm:$0xff] }
  0xf4   :  { %v586_v29 = vadd.f32 %v582_v13, %v581_v42  ;;  %v721_v10 = vadd.f32 %v2853_v4, %v692_v32  ;;  %v817_v28 = vmul.f32 %v2855_v5, %v2289_v31  ;;  %v818_v6 = vmul.f32 %v2856_v21, %v2289_v31  ;;  %v2863_v1 = vld [vmem:[#allocation43_spill] sm:$0xff]  ;;  %v2864_v20 = vld [vmem:[#allocation56_spill] sm:$0xff]  ;;  %v2865_v9 = vld [vmem:[#allocation57_spill] sm:$0xff] }
  0xf5   :  { %v722_v44 = vadd.f32 %v2854_v15, %v693_v53  ;;  %v819_v61 = vmul.f32 %v2857_v55, %v2289_v31  ;;  %v723_v19 = vadd.f32 %v2858_v47, %v694_v38  ;;  %v724_v45 = vadd.f32 %v2859_v12, %v695_v43  ;;  %v2867_v42 = vld [vmem:[#allocation65_spill] sm:$0xff]  ;;  %v2868_v4 = vld [vmem:[#allocation66_spill] sm:$0xff]  ;;  %v2869_v15 = vld [vmem:[#allocation67_spill] sm:$0xff] }
  0xf6   :  { %v588_v33 = vadd.f32 %v586_v29, %v583_v46  ;;  %v729_v62 = vmax.f32 %v721_v10, 0.0  ;;  %v820_v25 = vmul.f32 %v2860_v58, %v2289_v31  ;;  %v861_v59 = vmul.f32 %v2861_v14, %v2299_v36  ;;  %v2870_v5 = vld [vmem:[#allocation70_spill] sm:$0xff]  ;;  %v2871_v55 = vld [vmem:[#allocation71_spill] sm:$0xff]  ;;  %v2872_v12 = vld [vmem:[#allocation68_spill] sm:$0xff] }
  0xf7   :  { %v730_v8 = vmax.f32 %v722_v44, 0.0  ;;  %v862_v23 = vmul.f32 %v2862_v30, %v2299_v36  ;;  %v584_v2 = vmul.f32 %v2863_v1, %v555_v27  ;;  %v863_v48 = vmul.f32 %v2866_v3, %v2299_v36  ;;  %v2878_v30 = vld [vmem:[#allocation58_spill] sm:$0xff]  ;;  %v2881_v3 = vld [vmem:[#allocation81_spill] sm:$0xff] }
  0xf8   :  { %v758_v24 = vmul.f32 %v2864_v20, %v729_v62  ;;  %v864_v13 = vmul.f32 %v2867_v42, %v2299_v36  ;;  %v869_v51 = vadd.f32 %v861_v59, %v817_v28  ;;  %v415_v60 = vadd.f32 %v413_v52, %v236_v39  ;;  %v2873_v39 = vld [vmem:[#allocation69_spill] sm:$0xff] }
  0xf9   :  { %v759_v26 = vmul.f32 %v2865_v9, %v730_v8  ;;  %v590_v32 = vadd.f32 %v588_v33, %v584_v2  ;;  %v731_v46 = vmax.f32 %v723_v19, 0.0  ;;  %v870_v53 = vadd.f32 %v862_v23, %v818_v6  ;;  %v2874_v6 = vld [vmem:[#allocation72_spill] sm:$0xff]  ;;  %v2876_v8 = vld [vmem:[#allocation74_spill] sm:$0xff]  ;;  %v2879_v20 = vld [vmem:[#allocation77_spill] sm:$0xff] }
  0xfa   :  { %v732_v29 = vmax.f32 %v724_v45, 0.0  ;;  %v871_v38 = vadd.f32 %v863_v48, %v819_v61  ;;  %v872_v43 = vadd.f32 %v864_v13, %v820_v25  ;;  %v898_v27 = vadd.f32 %v2868_v4, %v869_v51  ;;  %v2875_v45 = vld [vmem:[#allocation73_spill] sm:$0xff]  ;;  %v2877_v25 = vld [vmem:[#allocation75_spill] sm:$0xff]  ;;  %v2880_v9 = vld [vmem:[#allocation80_spill] sm:$0xff] }
  0xfb   :  { %v763_v10 = vadd.f32 %v759_v26, %v758_v24  ;;  %v899_v44 = vadd.f32 %v2869_v15, %v870_v53  ;;  %v994_v21 = vmul.f32 %v2870_v5, %v2289_v31  ;;  %v995_v47 = vmul.f32 %v2871_v55, %v2289_v31 }
  0xfc   :  { %v900_v28 = vadd.f32 %v2872_v12, %v871_v38  ;;  %v901_v52 = vadd.f32 %v2873_v39, %v872_v43  ;;  %v906_v33 = vmax.f32 %v898_v27, 0.0  ;;  %v996_v61 = vmul.f32 %v2874_v6, %v2289_v31 }
  0xfd   :  { %v907_v19 = vmax.f32 %v899_v44, 0.0  ;;  %v997_v62 = vmul.f32 %v2875_v45, %v2289_v31  ;;  %v1038_v58 = vmul.f32 %v2876_v8, %v2299_v36  ;;  %v1039_v14 = vmul.f32 %v2877_v25, %v2299_v36 }
  0xfe   :  { %v592_v59 = vadd.f32 %v590_v32, %v415_v60  ;;  %v760_v23 = vmul.f32 %v2878_v30, %v731_v46  ;;  %v908_v1 = vmax.f32 %v900_v28, 0.0  ;;  %v935_v2 = vmul.f32 %v2782_v7, %v906_v33  ;;  %v2882_v7 = vld [vmem:[#allocation59_spill] sm:$0xff]  ;;  %v2886_v28 = vld [vmem:[#allocation93_spill] sm:$0xff] }
  0xff   :  { %v936_v24 = vmul.f32 %v2879_v20, %v907_v19  ;;  %v1040_v26 = vmul.f32 %v2880_v9, %v2299_v36  ;;  %v1041_v48 = vmul.f32 %v2881_v3, %v2299_v36  ;;  %v1046_v42 = vadd.f32 %v1038_v58, %v994_v21  ;;  %v2883_v21 = vld [vmem:[#allocation88_spill] sm:$0xff]  ;;  %v2888_v33 = vld [vmem:[#allocation87_spill] sm:$0xff] }
 0x100   :  { %v765_v13 = vadd.f32 %v763_v10, %v760_v23  ;;  %v909_v51 = vmax.f32 %v901_v52, 0.0  ;;  %v937_v53 = vmul.f32 %v2785_v34, %v908_v1  ;;  %v1047_v38 = vadd.f32 %v1039_v14, %v995_v47  ;;  %v2887_v52 = vld [vmem:[#allocation79_spill] sm:$0xff]  ;;  %v2889_v19 = vld [vmem:[#allocation96_spill] sm:$0xff] }
 0x101   :  { %v940_v60 = vadd.f32 %v936_v24, %v935_v2  ;;  %v1048_v32 = vadd.f32 %v1040_v26, %v996_v61  ;;  %v1049_v46 = vadd.f32 %v1041_v48, %v997_v62  ;;  %v1075_v43 = vadd.f32 %v2787_v22, %v1046_v42  ;;  %v2884_v22 = vld [vmem:[#allocation89_spill] sm:$0xff]  ;;  %v2891_v48 = vld [vmem:[#allocation98_spill] sm:$0xff]  ;;  %v2892_v42 = vld [vmem:[#allocation99_spill] sm:$0xff] }
 0x102   :  { %v761_v4 = vmul.f32 %v2882_v7, %v732_v29  ;;  %v1076_v27 = vadd.f32 %v2788_v18, %v1047_v38  ;;  %v1171_v15 = vmul.f32 %v2789_v49, %v2289_v31  ;;  %v1172_v44 = vmul.f32 %v2790_v50, %v2289_v31  ;;  %v2885_v29 = vld [vmem:[#allocation92_spill] sm:$0xff]  ;;  %v2890_v62 = vld [vmem:[#allocation97_spill] sm:$0xff] }
 0x103   :  { %v942_v10 = vadd.f32 %v940_v60, %v937_v53  ;;  %v1077_v5 = vadd.f32 %v2791_v11, %v1048_v32  ;;  %v1083_v34 = vmax.f32 %v1075_v43, 0.0  ;;  %v1173_v55 = vmul.f32 %v2883_v21, %v2289_v31  ;;  %v2893_v53 = vld [vmem:[#allocation100_spill] sm:$0xff] }
 0x104   :  { %v1084_v47 = vmax.f32 %v1076_v27, 0.0  ;;  %v1174_v12 = vmul.f32 %v2884_v22, %v2289_v31  ;;  %v1215_v18 = vmul.f32 %v2885_v29, %v2299_v36  ;;  %v1216_v49 = vmul.f32 %v2886_v28, %v2299_v36  ;;  %v2894_v38 = vld [vmem:[#allocation104_spill] sm:$0xff]  ;;  %v2901_v28 = vld [vmem:[#allocation95_spill] sm:$0xff] }
 0x105   :  { %v767_v39 = vadd.f32 %v765_v13, %v761_v4  ;;  %v938_v50 = vmul.f32 %v2887_v52, %v909_v51  ;;  %v1078_v6 = vadd.f32 %v2888_v33, %v1049_v46  ;;  %v1112_v11 = vmul.f32 %v2797_v16, %v1083_v34  ;;  %v2898_v4 = vld [vmem:[#allocation108_spill] sm:$0xff]  ;;  %v2902_v52 = vld [vmem:[#allocation110_spill] sm:$0xff] }
 0x106   :  { %v1113_v61 = vmul.f32 %v2798_v35, %v1084_v47  ;;  %v1217_v45 = vmul.f32 %v2889_v19, %v2299_v36  ;;  %v1218_v8 = vmul.f32 %v2890_v62, %v2299_v36  ;;  %v1223_v58 = vadd.f32 %v1215_v18, %v1171_v15  ;;  %v2900_v29 = vld [vmem:[#allocation112_spill] sm:$0xff] }
 0x107   :  { %v769_v25 = vadd.f32 %v767_v39, %v592_v59  ;;  %v944_v14 = vadd.f32 %v942_v10, %v938_v50  ;;  %v1224_v30 = vadd.f32 %v1216_v49, %v1172_v44  ;;  %v1085_v23 = vmax.f32 %v1077_v5, 0.0  ;;  %v2899_v44 = vld [vmem:[#allocation106_spill] sm:$0xff]  ;;  %v2903_v50 = vld [vmem:[#allocation113_spill] sm:$0xff] }
 0x108   :  { %v1225_v1 = vadd.f32 %v1217_v45, %v1173_v55  ;;  %v1226_v2 = vadd.f32 %v1218_v8, %v1174_v12  ;;  %v1252_v20 = vadd.f32 %v2047_v63, %v1223_v58  ;;  %v1086_v24 = vmax.f32 %v1078_v6, 0.0  ;;  %v2904_v6 = vld [vmem:[#allocation114_spill] sm:$0xff]  ;;  %v2906_v58 = vld [vmem:[#allocation116_spill] sm:$0xff] }
 0x109   :  { %v1117_v9 = vadd.f32 %v1113_v61, %v1112_v11  ;;  %v1253_v16 = vadd.f32 %v2800_v17, %v1224_v30  ;;  %v1348_v35 = vmul.f32 %v2035_v41, %v2289_v31  ;;  %v1349_v59 = vmul.f32 %v2891_v48, %v2289_v31  ;;  %v2895_v17 = vld [vmem:[#allocation105_spill] sm:$0xff]  ;;  %v2896_v41 = vld [vmem:[#allocation94_spill] sm:$0xff]  ;;  %v2905_v61 = vld [vmem:[#allocation115_spill] sm:$0xff] }
 0x10a   :  { %v1254_v26 = vadd.f32 %v2801_v0, %v1225_v1  ;;  %v1260_v3 = vmax.f32 %v1252_v20, 0.0  ;;  %v1350_v13 = vmul.f32 %v2892_v42, %v2289_v31  ;;  %v1351_v63 = vmul.f32 %v2893_v53, %v2289_v31  ;;  %v2897_v0 = vld [vmem:[#allocation103_spill] sm:$0xff] }
 0x10b   :  { %v1261_v51 = vmax.f32 %v1253_v16, 0.0  ;;  %v1392_v60 = vmul.f32 %v2894_v38, %v2299_v36  ;;  %v1393_v32 = vmul.f32 %v2895_v17, %v2299_v36  ;;  %v1114_v46 = vmul.f32 %v2896_v41, %v1085_v23  ;;  %v2907_v30 = vld [vmem:[#allocation111_spill] sm:$0xff] }
 0x10c   :  { %v1255_v43 = vadd.f32 %v2897_v0, %v1226_v2  ;;  %v1262_v7 = vmax.f32 %v1254_v26, 0.0  ;;  %v1289_v27 = vmul.f32 %v2898_v4, %v1260_v3  ;;  %v1394_v10 = vmul.f32 %v2899_v44, %v2299_v36 }
 0x10d   :  { %v1290_v15 = vmul.f32 %v2806_v40, %v1261_v51  ;;  %v1395_v31 = vmul.f32 %v2805_v57, %v2299_v36  ;;  %v1400_v5 = vadd.f32 %v1392_v60, %v1348_v35  ;;  %v946_v34 = vadd.f32 %v944_v14, %v769_v25 }
 0x10e   :  { %v1119_v21 = vadd.f32 %v1117_v9, %v1114_v46  ;;  %v1401_v55 = vadd.f32 %v1393_v32, %v1349_v59  ;;  %v1402_v22 = vadd.f32 %v1394_v10, %v1350_v13  ;;  %v1115_v49 = vmul.f32 %v2901_v28, %v1086_v24 }
 0x10f   :  { %v1294_v47 = vadd.f32 %v1290_v15, %v1289_v27  ;;  %v1403_v12 = vadd.f32 %v1395_v31, %v1351_v63  ;;  %v1429_v18 = vadd.f32 %v2900_v29, %v1400_v5  ;;  %v1263_v39 = vmax.f32 %v1255_v43, 0.0 }
 0x110   :  { %v1291_v40 = vmul.f32 %v2902_v52, %v1262_v7  ;;  %v1430_v33 = vadd.f32 %v2903_v50, %v1401_v55  ;;  %v1431_v11 = vadd.f32 %v2904_v6, %v1402_v22  ;;  %v1121_v19 = vadd.f32 %v1119_v21, %v1115_v49 }
 0x111   :  { %v1432_v57 = vadd.f32 %v2905_v61, %v1403_v12  ;;  %v1437_v36 = vmax.f32 %v1429_v18, 0.0  ;;  %v1292_v23 = vmul.f32 %v2907_v30, %v1263_v39  ;;  %v1483_v59 = vstv %s2514_s4 }
 0x112   :  { %v1296_v45 = vadd.f32 %v1294_v47, %v1291_v40  ;;  %v1438_v62 = vmax.f32 %v1430_v33, 0.0  ;;  %v1439_v8 = vmax.f32 %v1431_v11, 0.0  ;;  %v1123_v14 = vadd.f32 %v1121_v19, %v946_v34 }
 0x113   :  { %v1466_v25 = vmul.f32 %v2906_v58, %v1437_v36  ;;  %v1440_v1 = vmax.f32 %v1432_v57, 0.0 }
 0x114   :  { %v1467_v2 = vmul.f32 %v2819_v54, %v1438_v62  ;;  %v1298_v20 = vadd.f32 %v1296_v45, %v1292_v23  ;;  %v1468_v24 = vmul.f32 %v2820_v56, %v1439_v8 }
 0x115   :  { %v1469_v35 = vmul.f32 %v2821_v37, %v1440_v1 }
 0x116   :  { %v1471_v9 = vadd.f32 %v1467_v2, %v1466_v25  ;;  %v1300_v16 = vadd.f32 %v1298_v20, %v1123_v14 }
 0x118   :  { %v1473_v26 = vadd.f32 %v1471_v9, %v1468_v24 }
 0x11a   :  { %v1475_v3 = vadd.f32 %v1473_v26, %v1469_v35 }
 0x11c   :  { %v1477_v48 = vadd.f32 %v1475_v3, %v1300_v16 }
 0x11e   :  { %1480 = vadd.xlane.f32.xlu1 %v1477_v48 }
 0x175   :  { %v1479_v42 = vpop.xlane.xlu0 %1478 }
 0x176   :  { %v1484_v13 = vadd.f32 %v1483_v59, %v1479_v42 }
 0x178   :  { %1487 = vst.msk [vmem:[%s2515_s5] sm:$0xff] %vm1486_vm0, %v1484_v13 }
 0x1ab   :  { %v1481_v56 = vpop.xlane.xlu1 %1480 }
 0x1ac   :  { %v1485_v54 = vadd.f32 %v1483_v59, %v1481_v56 }
 0x1ae   :  { %1488 = vst.msk [vmem:[%s2515_s5 + $0x8] sm:$0xff] %vm1486_vm0, %v1485_v54 }
 0x1af   :  { %1493 = vsyncpa [#allocation4], 1 }
 0x1b0   :  { %1494 = vsyncpa [#allocation6], 1 }

</bundles_post_ra>
